<compile_context>
chip_gen: v6e
topology: v6e:2x2x1
jax: 0.10.0
libtpu: 0.0.40
codegen_flags: <defaults>
</compile_context>

<pallas_src>
import functools
import math

import jax
import jax.numpy as jnp
from jax import lax
from jax.experimental import pallas as pl
from jax.experimental.pallas import tpu as pltpu

F32 = jnp.float32
BF16 = jnp.bfloat16
NEG_INF = -1e9
VMEM = pl.BlockSpec(memory_space=pltpu.MemorySpace.VMEM)


# --------------------------------------------------------------------- in-kernel helpers
def _layernorm(x, g, b, eps=1e-5):
    mu = jnp.mean(x, axis=-1, keepdims=True)
    var = jnp.mean((x - mu) ** 2, axis=-1, keepdims=True)
    return (x - mu) * lax.rsqrt(var + eps) * g + b


def _gelu(y):  # GPT-2 "gelu_new" (tanh approximation), f32
    return 0.5 * y * (1.0 + jnp.tanh(0.7978845608028654 * (y + 0.044715 * y * y * y)))


def _softmax_lastdim(s):
    s = s - jnp.max(s, axis=-1, keepdims=True)
    p = jnp.exp(s)
    return p * pl.reciprocal(jnp.sum(p, axis=-1, keepdims=True), approx=True)


# --------------------------------------------------------------------- encoder head kernel
def encoder_head_kernel(fm_ref, fc_w_ref, fc_b_ref,
                        wq_ref, bq_ref, wk_ref, bk_ref, wv_ref, bv_ref,
                        wo_ref, bo_ref, enc_ref, attn_scr, *, num_heads):
    # fm: (N, HW, C) f32 — channels on the lane axis; GAP reduces over sublanes.
    pooled = jnp.mean(fm_ref[...], axis=1)                                     # (N, C)
    # Dropout(0.2) -> identity at inference; fc: (C) -> (E).
    x = jnp.dot(pooled.astype(BF16), fc_w_ref[...],
                preferred_element_type=F32) + fc_b_ref[...]                    # (N, E)

    # nn.MultiheadAttention on enc.unsqueeze(1) (batch_first=False) == self-attention
    # over the N image tokens (seq = N, batch = 1).  1/sqrt(d) is folded into wq/bq.
    E = x.shape[-1]
    d = E // num_heads
    xb = x.astype(BF16)
    q = jnp.dot(xb, wq_ref[...], preferred_element_type=F32) + bq_ref[...]
    k = jnp.dot(xb, wk_ref[...], preferred_element_type=F32) + bk_ref[...]
    v = jnp.dot(xb, wv_ref[...], preferred_element_type=F32) + bv_ref[...]

    for h in range(num_heads):                  # static unroll; heads write into scratch
        sl = slice(h * d, (h + 1) * d)
        s = lax.dot_general(q[:, sl], k[:, sl],
                            dimension_numbers=(((1,), (1,)), ((), ())),
                            preferred_element_type=F32)                        # (N, N)
        p = _softmax_lastdim(s)
        attn_scr[:, sl] = jnp.dot(p, v[:, sl], preferred_element_type=F32)     # (N, d)

    enc_ref[...] = (jnp.dot(attn_scr[...].astype(BF16), wo_ref[...],
                            preferred_element_type=F32) + bo_ref[...]).astype(enc_ref.dtype)


# --------------------------------------------------------------------- fused decoder stack kernel
def decoder_stack_kernel(hid0_ref, mask_ref, enc_ref,
                         ln1_g_ref, ln1_b_ref, attn_w_ref, attn_b_ref,
                         attn_proj_w_ref, attn_proj_b_ref,
                         xv_w_ref, xv_b_ref, xproj_w_ref, xproj_b_ref,
                         ln2_g_ref, ln2_b_ref, fc_w_ref, fc_b_ref,
                         proj_w_ref, proj_b_ref,
                         lnf_g_ref, lnf_b_ref,
                         out_ref, h_scr, bias_scr, attn_scr, *, num_heads):
    # grid = (N, L): axis 0 = sample ("parallel"), axis 1 = layer ("arbitrary").
    layer = pl.program_id(1)
    S, E = h_scr.shape
    d = E // num_heads

    @pl.when(layer == 0)
    def _():
        # load this sample's embeddings into the VMEM carry
        h_scr[...] = hid0_ref[...]
        # build the additive causal + padding bias ONCE per sample and cache it
        row = lax.broadcasted_iota(jnp.int32, (S, S), 0)
        col = lax.broadcasted_iota(jnp.int32, (S, S), 1)
        causal = jnp.where(row >= col, 0.0, NEG_INF).astype(F32)               # (S, S)
        pad = (1.0 - mask_ref[...]) * NEG_INF                                  # (1, S)
        bias_scr[...] = causal + pad

    h = h_scr[...]                                                             # (S, E) f32

    # ---------------- masked self-attention ----------------
    x = _layernorm(h, ln1_g_ref[...], ln1_b_ref[...])
    # 1/sqrt(d) already folded into the q columns of attn_w / attn_b at init.
    qkv = jnp.dot(x.astype(BF16), attn_w_ref[...],
                  preferred_element_type=F32) + attn_b_ref[...]                # (S, 3E)
    q = qkv[:, :E]
    k = qkv[:, E:2 * E]
    v = qkv[:, 2 * E:]
    bias = bias_scr[...]

    for hh in range(num_heads):                 # static unroll; no concat, scratch store
        sl = slice(hh * d, (hh + 1) * d)
        s = lax.dot_general(q[:, sl], k[:, sl],
                            dimension_numbers=(((1,), (1,)), ((), ())),
                            preferred_element_type=F32) + bias                 # (S, S)
        p = _softmax_lastdim(s)
        attn_scr[:, sl] = jnp.dot(p, v[:, sl], preferred_element_type=F32)     # (S, d)

    # output projection + residual, fused
    h = h + jnp.dot(attn_scr[...].astype(BF16), attn_proj_w_ref[...],
                    preferred_element_type=F32) + attn_proj_b_ref[...]

    # ---------------- cross-attention to the single image token ----------------
    # encoder_hidden_states has sequence length 1; softmax over one key is exactly
    # 1.0, so the block's output is exactly the projected value of that key,
    # broadcast over the target sequence.
    v_cross = jnp.dot(enc_ref[...].astype(BF16), xv_w_ref[...],
                      preferred_element_type=F32) + xv_b_ref[...]              # (1, E)
    cross = jnp.dot(v_cross.astype(BF16), xproj_w_ref[...],
                    preferred_element_type=F32) + xproj_b_ref[...]             # (1, E)
    h = h + cross                                                              # broadcast over S

    # ---------------- MLP ----------------
    x = _layernorm(h, ln2_g_ref[...], ln2_b_ref[...])
    m = _gelu(jnp.dot(x.astype(BF16), fc_w_ref[...],
                      preferred_element_type=F32) + fc_b_ref[...])
    h = h + jnp.dot(m.astype(BF16), proj_w_ref[...],
                    preferred_element_type=F32) + proj_b_ref[...]

    h_scr[...] = h                              # carry to the next layer

    # ---------------- final LayerNorm (last layer only); LM head is a separate call ----
    @pl.when(layer == pl.num_programs(1) - 1)
    def _():
        out_ref[...] = _layernorm(h, lnf_g_ref[...], lnf_b_ref[...]).astype(out_ref.dtype)


# --------------------------------------------------------------------- LM head kernel (vocab-tiled)
def lm_head_kernel(xf_ref, wte_ref, logits_ref):
    # logits tile = LN(h) @ wte_tile.T via dot_general (no transposed copy of wte)
    logits_ref[...] = lax.dot_general(
        xf_ref[...].astype(BF16), wte_ref[...],
        dimension_numbers=(((1,), (1,)), ((), ())),
        preferred_element_type=F32)


# --------------------------------------------------------------------- parameters
def init_params(key, cfg):
    E, H, L, F_, V, ML = cfg["E"], cfg["H"], cfg["L"], cfg["F"], cfg["V"], cfg["max_len"]
    d = E // H
    scale = 1.0 / math.sqrt(d)
    keys = iter(jax.random.split(key, 64))

    def nrm(shape, s=0.02):
        return jax.random.normal(next(keys), shape, F32) * s

    p = {}
    # ---- image encoder stand-in (conv stem + GAP + Dropout + Linear fc) ----
    p["conv1_w"], p["conv1_b"] = nrm((8, 3, 3, 3)), jnp.zeros((1, 8, 1, 1), F32)
    p["conv2_w"], p["conv2_b"] = nrm((16, 8, 3, 3)), jnp.zeros((1, 16, 1, 1), F32)
    p["fc_w"], p["fc_b"] = nrm((16, E)).astype(BF16), jnp.zeros((1, E), F32)
    # ---- nn.MultiheadAttention(embed_dim=E, num_heads=H); 1/sqrt(d) folded into q ----
    p["mha_wq"] = (nrm((E, E)) * scale).astype(BF16)
    p["mha_bq"] = jnp.zeros((1, E), F32)
    for n in ("k", "v", "o"):
        p[f"mha_w{n}"] = nrm((E, E)).astype(BF16)
        p[f"mha_b{n}"] = jnp.zeros((1, E), F32)
    # ---- GPT-2-style decoder with cross-attention ----
    p["wte"] = nrm((V, E))                      # f32 for the embedding gather
    V_pad = ((V + 127) // 128) * 128            # lane-dense, 128-multiple vocab for the LM head
    p["wte_lm"] = jnp.pad(p["wte"], ((0, V_pad - V), (0, 0))).astype(BF16)
    p["wpe"] = nrm((ML, E))
    p["lnf_g"], p["lnf_b"] = jnp.ones((1, E), F32), jnp.zeros((1, E), F32)
    # Per-layer weights stacked along a leading L axis so the whole decoder runs as ONE
    # pallas_call with a layer grid axis.  Matmul weights cast to bf16 once, here; the
    # 1/sqrt(d) attention scale is folded into the q columns of attn_w at init.
    # NOTE: the cross-attention LayerNorm / q projection / K half of the KV projection
    # provably cannot affect the output when the encoder sequence length is 1, so the
    # stand-in only carries the V and output projections.
    attn_w = nrm((L, E, 3 * E)).at[:, :, :E].multiply(scale)
    p["dec"] = dict(
        ln1_g=jnp.ones((L, 1, E), F32), ln1_b=jnp.zeros((L, 1, E), F32),
        attn_w=attn_w.astype(BF16), attn_b=jnp.zeros((L, 1, 3 * E), F32),
        attn_proj_w=nrm((L, E, E)).astype(BF16), attn_proj_b=jnp.zeros((L, 1, E), F32),
        xv_w=nrm((L, E, E)).astype(BF16), xv_b=jnp.zeros((L, 1, E), F32),
        xproj_w=nrm((L, E, E)).astype(BF16), xproj_b=jnp.zeros((L, 1, E), F32),
        ln2_g=jnp.ones((L, 1, E), F32), ln2_b=jnp.zeros((L, 1, E), F32),
        fc_w=nrm((L, E, F_)).astype(BF16), fc_b=jnp.zeros((L, 1, F_), F32),
        proj_w=nrm((L, F_, E)).astype(BF16), proj_b=jnp.zeros((L, 1, E), F32),
    )
    return p


# --------------------------------------------------------------------- cost estimates
def _decoder_cost_estimate(N, S, E, F_, L, H):
    qkv = 2 * S * E * 3 * E
    scores = 2 * S * S * E
    pv = 2 * S * S * E
    attn_proj = 2 * S * E * E
    cross = 2 * 2 * E * E
    mlp = 2 * 2 * S * E * F_
    flops = N * L * (qkv + scores + pv + attn_proj + cross + mlp)
    trans = N * L * (H * S * S + S * F_)
    w_bytes = L * (6 * E * E + 2 * E * F_) * 2          # bf16 per-layer weights
    bytes_accessed = N * w_bytes + 2 * N * S * E * 4 + N * (S + E) * 4
    return pl.CostEstimate(flops=int(flops), transcendentals=int(trans),
                           bytes_accessed=int(bytes_accessed))


def _pick_vocab_tile(v_pad, max_tile=2048):
    t = min(v_pad, max_tile)
    t -= t % 128
    while v_pad % t:
        t -= 128
    return t


# --------------------------------------------------------------------- model wrappers
def image_encoder(p, images, cfg):
    # TODO(synk): the tiny conv stem runs through XLA's conv_general_dilated rather
    # than a Pallas im2col kernel.
    dn = ("NCHW", "OIHW", "NCHW")
    x = lax.conv_general_dilated(images, p["conv1_w"], (2, 2), ((1, 1), (1, 1)),
                                 dimension_numbers=dn)
    x = jnp.maximum(x + p["conv1_b"], 0.0)
    x = lax.conv_general_dilated(x, p["conv2_w"], (2, 2), ((1, 1), (1, 1)),
                                 dimension_numbers=dn)
    x = jnp.maximum(x + p["conv2_b"], 0.0)
    N, C, Hh, Ww = x.shape
    # Channels on the lane axis: (N, HW, C), so the GAP is a sublane reduction and
    # the C-contraction of fc is layout-native.
    fm = jnp.transpose(x.reshape(N, C, Hh * Ww), (0, 2, 1))

    # GAP + Dropout(identity) + fc + MultiheadAttention + out-proj, fused in one kernel.
    return pl.pallas_call(
        functools.partial(encoder_head_kernel, num_heads=cfg["H"]),
        out_shape=jax.ShapeDtypeStruct((N, cfg["E"]), F32),
        in_specs=[VMEM] * 11,
        out_specs=VMEM,
        scratch_shapes=[pltpu.VMEM((N, cfg["E"]), F32)],
    )(fm, p["fc_w"], p["fc_b"],
      p["mha_wq"], p["mha_bq"], p["mha_wk"], p["mha_bk"],
      p["mha_wv"], p["mha_bv"], p["mha_wo"], p["mha_bo"])


def gpt2_decoder(p, input_ids, attention_mask, enc, cfg):
    N, S = input_ids.shape
    E, H, L, F_, V = cfg["E"], cfg["H"], cfg["L"], cfg["F"], cfg["V"]

    # token + positional embeddings (gather kept as XLA glue)
    hidden0 = jnp.take(p["wte"], input_ids, axis=0) + p["wpe"][:S][None]      # (N, S, E)
    mask3 = attention_mask.astype(F32)[:, None, :]                            # (N, 1, S)
    enc3 = enc[:, None, :]                                                    # (N, 1, E)
    d = p["dec"]

    def shared(shape):
        return pl.BlockSpec(shape, lambda n, l: (0,) * len(shape))

    def per_sample(shape):       # sample axis squeezed; one sample per "parallel" grid step
        return pl.BlockSpec((None,) + shape, lambda n, l: (n,) + (0,) * len(shape))

    def per_layer(shape):        # weights stacked along a leading L axis, squeezed in-kernel
        return pl.BlockSpec((None,) + shape, lambda n, l: (l,) + (0,) * len(shape))

    in_specs = [
        per_sample((S, E)),                            # hidden0
        per_sample((1, S)),                            # attention mask
        per_sample((1, E)),                            # encoder hidden (single token)
        per_layer((1, E)), per_layer((1, E)),          # ln1 g / b
        per_layer((E, 3 * E)), per_layer((1, 3 * E)),  # qkv w / b (scale folded)
        per_layer((E, E)), per_layer((1, E)),          # attn proj w / b
        per_layer((E, E)), per_layer((1, E)),          # cross V w / b
        per_layer((E, E)), per_layer((1, E)),          # cross proj w / b
        per_layer((1, E)), per_layer((1, E)),          # ln2 g / b
        per_layer((E, F_)), per_layer((1, F_)),        # mlp fc w / b
        per_layer((F_, E)), per_layer((1, E)),         # mlp proj w / b
        shared((1, E)), shared((1, E)),                # final LN g / b
    ]

    # Decoder stack: grid = (samples, layers).  The sample axis is "parallel"
    # (v7x has 2 TensorCores; each core gets its own carry scratches), the layer
    # axis is the sequential reduction-style carry axis.
    hidden_f = pl.pallas_call(
        functools.partial(decoder_stack_kernel, num_heads=H),
        out_shape=jax.ShapeDtypeStruct((N, S, E), F32),
        grid_spec=pltpu.PrefetchScalarGridSpec(
            num_scalar_prefetch=0,
            grid=(N, L),
            in_specs=in_specs,
            out_specs=per_sample((S, E)),
            scratch_shapes=[pltpu.VMEM((S, E), F32),   # hidden carry
                            pltpu.VMEM((S, S), F32),   # cached causal+pad bias
                            pltpu.VMEM((S, E), F32)],  # per-head attention output
        ),
        compiler_params=pltpu.CompilerParams(
            dimension_semantics=("parallel", "arbitrary")),
        cost_estimate=_decoder_cost_estimate(N, S, E, F_, L, H),
    )(hidden0, mask3, enc3,
      d["ln1_g"], d["ln1_b"], d["attn_w"], d["attn_b"],
      d["attn_proj_w"], d["attn_proj_b"],
      d["xv_w"], d["xv_b"], d["xproj_w"], d["xproj_b"],
      d["ln2_g"], d["ln2_b"], d["fc_w"], d["fc_b"],
      d["proj_w"], d["proj_b"],
      p["lnf_g"], p["lnf_b"])

    # ---- tied LM head: separate pallas_call tiled over the (128-padded) vocab dim ----
    xf = hidden_f.reshape(N * S, E)
    V_pad = p["wte_lm"].shape[0]
    TV = _pick_vocab_tile(V_pad)
    lm_ce = pl.CostEstimate(flops=int(2 * N * S * E * V_pad), transcendentals=0,
                            bytes_accessed=int(V_pad * E * 2 + N * S * E * 4
                                               + N * S * V_pad * 4))
    logits_pad = pl.pallas_call(
        lm_head_kernel,
        out_shape=jax.ShapeDtypeStruct((N * S, V_pad), F32),
        grid_spec=pltpu.PrefetchScalarGridSpec(
            num_scalar_prefetch=0,
            grid=(V_pad // TV,),
            in_specs=[pl.BlockSpec((N * S, E), lambda j: (0, 0)),
                      pl.BlockSpec((TV, E), lambda j: (j, 0))],
            out_specs=pl.BlockSpec((N * S, TV), lambda j: (0, j)),
        ),
        compiler_params=pltpu.CompilerParams(dimension_semantics=("parallel",)),
        cost_estimate=lm_ce,
    )(xf, p["wte_lm"])

    return logits_pad[:, :V].reshape(N, S, V)


def image_captioning_forward(params, image_batch, target_batch, attention_mask, cfg):
    enc = image_encoder(params, image_batch, cfg)   # (N, E) == encoder_hidden_states.unsqueeze(1)
    return gpt2_decoder(params, target_batch, attention_mask, enc, cfg)


# --------------------------------------------------------------------- main
if __name__ == "__main__":
    cfg = dict(E=32, H=4, L=2, F=64, V=64, max_len=64)
    key = jax.random.PRNGKey(0)
    kparam, kimg, ktok = jax.random.split(key, 3)

    params = init_params(kparam, cfg)

    N, S = 2, 8
    image_batch = jax.random.normal(kimg, (N, 3, 16, 16), F32)       # NCHW, like PyTorch
    target_batch = jax.random.randint(ktok, (N, S), 0, cfg["V"], jnp.int32)
    attention_mask = jnp.ones((N, S), jnp.int32).at[1, 6:].set(0)    # pad last 2 tokens of row 1

    fwd = jax.jit(functools.partial(image_captioning_forward, cfg=cfg))
    logits = fwd(params, image_batch, target_batch, attention_mask)
    jax.block_until_ready(logits)

    assert logits.shape == (N, S, cfg["V"]), logits.shape
    assert bool(jnp.all(jnp.isfinite(logits)))
    print("KERNEL_OK")
</pallas_src>

<mosaic_0001>
module attributes {stable_mosaic.version = 11 : i64} {
  func.func @encoder_head_kernel(%arg0: memref<2x16x16xf32, #tpu.memory_space<vmem>>, %arg1: memref<16x32xbf16, #tpu.memory_space<vmem>>, %arg2: memref<1x32xf32, #tpu.memory_space<vmem>>, %arg3: memref<32x32xbf16, #tpu.memory_space<vmem>>, %arg4: memref<1x32xf32, #tpu.memory_space<vmem>>, %arg5: memref<32x32xbf16, #tpu.memory_space<vmem>>, %arg6: memref<1x32xf32, #tpu.memory_space<vmem>>, %arg7: memref<32x32xbf16, #tpu.memory_space<vmem>>, %arg8: memref<1x32xf32, #tpu.memory_space<vmem>>, %arg9: memref<32x32xbf16, #tpu.memory_space<vmem>>, %arg10: memref<1x32xf32, #tpu.memory_space<vmem>>, %arg11: memref<2x32xf32, #tpu.memory_space<vmem>>, %arg12: memref<2x32xf32, #tpu.memory_space<vmem>>) attributes {dimension_semantics = [], scalar_prefetch = 0 : i64, scratch_operands = 1 : i64, tpu.core_type = #tpu.core_type<tc>} {
    %c0 = arith.constant 0 : index
    %c0_0 = arith.constant 0 : index
    %c0_1 = arith.constant 0 : index
    %0 = vector.load %arg0[%c0, %c0_0, %c0_1] : memref<2x16x16xf32, #tpu.memory_space<vmem>>, vector<2x16x16xf32>
    %cst = arith.constant dense<0.000000e+00> : vector<2x16xf32>
    %1 = vector.multi_reduction <add>, %0, %cst [1] : vector<2x16x16xf32> to vector<2x16xf32>
    %cst_2 = arith.constant 1.600000e+01 : f32
    %2 = vector.broadcast %cst_2 : f32 to vector<2x16xf32>
    %3 = arith.divf %1, %2 : vector<2x16xf32>
    %4 = arith.truncf %3 : vector<2x16xf32> to vector<2x16xbf16>
    %c0_3 = arith.constant 0 : index
    %c0_4 = arith.constant 0 : index
    %5 = vector.load %arg1[%c0_3, %c0_4] : memref<16x32xbf16, #tpu.memory_space<vmem>>, vector<16x32xbf16>
    %cst_5 = arith.constant dense<0.000000e+00> : vector<2x32xf32>
    %6 = tpu.matmul %4, %5, %cst_5 {dimension_numbers = #tpu.dot_dimension_numbers<[1], [0], [0], [1], [0, 0, 1, 1], [], []>} : vector<2x16xbf16>, vector<16x32xbf16>, vector<2x32xf32> -> vector<2x32xf32>
    %c0_6 = arith.constant 0 : index
    %c0_7 = arith.constant 0 : index
    %7 = vector.load %arg2[%c0_6, %c0_7] : memref<1x32xf32, #tpu.memory_space<vmem>>, vector<1x32xf32>
    %8 = vector.broadcast %7 : vector<1x32xf32> to vector<2x32xf32>
    %9 = arith.addf %6, %8 : vector<2x32xf32>
    %10 = arith.truncf %9 : vector<2x32xf32> to vector<2x32xbf16>
    %c0_8 = arith.constant 0 : index
    %c0_9 = arith.constant 0 : index
    %11 = vector.load %arg3[%c0_8, %c0_9] : memref<32x32xbf16, #tpu.memory_space<vmem>>, vector<32x32xbf16>
    %cst_10 = arith.constant dense<0.000000e+00> : vector<2x32xf32>
    %12 = tpu.matmul %10, %11, %cst_10 {dimension_numbers = #tpu.dot_dimension_numbers<[1], [0], [0], [1], [0, 0, 1, 1], [], []>} : vector<2x32xbf16>, vector<32x32xbf16>, vector<2x32xf32> -> vector<2x32xf32>
    %c0_11 = arith.constant 0 : index
    %c0_12 = arith.constant 0 : index
    %13 = vector.load %arg4[%c0_11, %c0_12] : memref<1x32xf32, #tpu.memory_space<vmem>>, vector<1x32xf32>
    %14 = vector.broadcast %13 : vector<1x32xf32> to vector<2x32xf32>
    %15 = arith.addf %12, %14 : vector<2x32xf32>
    %c0_13 = arith.constant 0 : index
    %c0_14 = arith.constant 0 : index
    %16 = vector.load %arg5[%c0_13, %c0_14] : memref<32x32xbf16, #tpu.memory_space<vmem>>, vector<32x32xbf16>
    %cst_15 = arith.constant dense<0.000000e+00> : vector<2x32xf32>
    %17 = tpu.matmul %10, %16, %cst_15 {dimension_numbers = #tpu.dot_dimension_numbers<[1], [0], [0], [1], [0, 0, 1, 1], [], []>} : vector<2x32xbf16>, vector<32x32xbf16>, vector<2x32xf32> -> vector<2x32xf32>
    %c0_16 = arith.constant 0 : index
    %c0_17 = arith.constant 0 : index
    %18 = vector.load %arg6[%c0_16, %c0_17] : memref<1x32xf32, #tpu.memory_space<vmem>>, vector<1x32xf32>
    %19 = vector.broadcast %18 : vector<1x32xf32> to vector<2x32xf32>
    %20 = arith.addf %17, %19 : vector<2x32xf32>
    %c0_18 = arith.constant 0 : index
    %c0_19 = arith.constant 0 : index
    %21 = vector.load %arg7[%c0_18, %c0_19] : memref<32x32xbf16, #tpu.memory_space<vmem>>, vector<32x32xbf16>
    %cst_20 = arith.constant dense<0.000000e+00> : vector<2x32xf32>
    %22 = tpu.matmul %10, %21, %cst_20 {dimension_numbers = #tpu.dot_dimension_numbers<[1], [0], [0], [1], [0, 0, 1, 1], [], []>} : vector<2x32xbf16>, vector<32x32xbf16>, vector<2x32xf32> -> vector<2x32xf32>
    %c0_21 = arith.constant 0 : index
    %c0_22 = arith.constant 0 : index
    %23 = vector.load %arg8[%c0_21, %c0_22] : memref<1x32xf32, #tpu.memory_space<vmem>>, vector<1x32xf32>
    %24 = vector.broadcast %23 : vector<1x32xf32> to vector<2x32xf32>
    %25 = arith.addf %22, %24 : vector<2x32xf32>
    %26 = vector.extract_strided_slice %15 {offsets = [0, 0], sizes = [2, 8], strides = [1, 1]} : vector<2x32xf32> to vector<2x8xf32>
    %27 = vector.extract_strided_slice %20 {offsets = [0, 0], sizes = [2, 8], strides = [1, 1]} : vector<2x32xf32> to vector<2x8xf32>
    %cst_23 = arith.constant dense<0.000000e+00> : vector<2x2xf32>
    %28 = tpu.matmul %26, %27, %cst_23 {dimension_numbers = #tpu.dot_dimension_numbers<[1], [1], [0], [0], [0, 0, 1, 0], [], []>} : vector<2x8xf32>, vector<2x8xf32>, vector<2x2xf32> -> vector<2x2xf32>
    %cst_24 = arith.constant dense<0xFF800000> : vector<2xf32>
    %29 = vector.multi_reduction <maximumf>, %28, %cst_24 [1] : vector<2x2xf32> to vector<2xf32>
    %30 = vector.shape_cast %29 : vector<2xf32> to vector<2x1xf32>
    %31 = vector.broadcast %30 : vector<2x1xf32> to vector<2x2xf32>
    %32 = arith.subf %28, %31 : vector<2x2xf32>
    %33 = math.exp %32 : vector<2x2xf32>
    %cst_25 = arith.constant dense<0.000000e+00> : vector<2xf32>
    %34 = vector.multi_reduction <add>, %33, %cst_25 [1] : vector<2x2xf32> to vector<2xf32>
    %35 = vector.shape_cast %34 : vector<2xf32> to vector<2x1xf32>
    %36 = tpu.reciprocal %35 {approx = true} : vector<2x1xf32> -> vector<2x1xf32>
    %37 = vector.broadcast %36 : vector<2x1xf32> to vector<2x2xf32>
    %38 = arith.mulf %33, %37 : vector<2x2xf32>
    %39 = vector.extract_strided_slice %25 {offsets = [0, 0], sizes = [2, 8], strides = [1, 1]} : vector<2x32xf32> to vector<2x8xf32>
    %cst_26 = arith.constant dense<0.000000e+00> : vector<2x8xf32>
    %40 = tpu.matmul %38, %39, %cst_26 {dimension_numbers = #tpu.dot_dimension_numbers<[1], [0], [0], [1], [0, 0, 1, 1], [], []>} : vector<2x2xf32>, vector<2x8xf32>, vector<2x8xf32> -> vector<2x8xf32>
    %c0_27 = arith.constant 0 : index
    %c0_28 = arith.constant 0 : index
    %41 = vector.load %arg12[%c0_27, %c0_28] : memref<2x32xf32, #tpu.memory_space<vmem>>, vector<2x8xf32>
    tpu.vector_store %arg12[%c0_27, %c0_28], %40 {strides = array<i32>} : memref<2x32xf32, #tpu.memory_space<vmem>>, vector<2x8xf32>,
    %42 = vector.extract_strided_slice %15 {offsets = [0, 8], sizes = [2, 8], strides = [1, 1]} : vector<2x32xf32> to vector<2x8xf32>
    %43 = vector.extract_strided_slice %20 {offsets = [0, 8], sizes = [2, 8], strides = [1, 1]} : vector<2x32xf32> to vector<2x8xf32>
    %cst_29 = arith.constant dense<0.000000e+00> : vector<2x2xf32>
    %44 = tpu.matmul %42, %43, %cst_29 {dimension_numbers = #tpu.dot_dimension_numbers<[1], [1], [0], [0], [0, 0, 1, 0], [], []>} : vector<2x8xf32>, vector<2x8xf32>, vector<2x2xf32> -> vector<2x2xf32>
    %cst_30 = arith.constant dense<0xFF800000> : vector<2xf32>
    %45 = vector.multi_reduction <maximumf>, %44, %cst_30 [1] : vector<2x2xf32> to vector<2xf32>
    %46 = vector.shape_cast %45 : vector<2xf32> to vector<2x1xf32>
    %47 = vector.broadcast %46 : vector<2x1xf32> to vector<2x2xf32>
    %48 = arith.subf %44, %47 : vector<2x2xf32>
    %49 = math.exp %48 : vector<2x2xf32>
    %cst_31 = arith.constant dense<0.000000e+00> : vector<2xf32>
    %50 = vector.multi_reduction <add>, %49, %cst_31 [1] : vector<2x2xf32> to vector<2xf32>
    %51 = vector.shape_cast %50 : vector<2xf32> to vector<2x1xf32>
    %52 = tpu.reciprocal %51 {approx = true} : vector<2x1xf32> -> vector<2x1xf32>
    %53 = vector.broadcast %52 : vector<2x1xf32> to vector<2x2xf32>
    %54 = arith.mulf %49, %53 : vector<2x2xf32>
    %55 = vector.extract_strided_slice %25 {offsets = [0, 8], sizes = [2, 8], strides = [1, 1]} : vector<2x32xf32> to vector<2x8xf32>
    %cst_32 = arith.constant dense<0.000000e+00> : vector<2x8xf32>
    %56 = tpu.matmul %54, %55, %cst_32 {dimension_numbers = #tpu.dot_dimension_numbers<[1], [0], [0], [1], [0, 0, 1, 1], [], []>} : vector<2x2xf32>, vector<2x8xf32>, vector<2x8xf32> -> vector<2x8xf32>
    %c0_33 = arith.constant 0 : index
    %c8 = arith.constant 8 : index
    %57 = vector.load %arg12[%c0_33, %c8] : memref<2x32xf32, #tpu.memory_space<vmem>>, vector<2x8xf32>
    tpu.vector_store %arg12[%c0_33, %c8], %56 {strides = array<i32>} : memref<2x32xf32, #tpu.memory_space<vmem>>, vector<2x8xf32>,
    %58 = vector.extract_strided_slice %15 {offsets = [0, 16], sizes = [2, 8], strides = [1, 1]} : vector<2x32xf32> to vector<2x8xf32>
    %59 = vector.extract_strided_slice %20 {offsets = [0, 16], sizes = [2, 8], strides = [1, 1]} : vector<2x32xf32> to vector<2x8xf32>
    %cst_34 = arith.constant dense<0.000000e+00> : vector<2x2xf32>
    %60 = tpu.matmul %58, %59, %cst_34 {dimension_numbers = #tpu.dot_dimension_numbers<[1], [1], [0], [0], [0, 0, 1, 0], [], []>} : vector<2x8xf32>, vector<2x8xf32>, vector<2x2xf32> -> vector<2x2xf32>
    %cst_35 = arith.constant dense<0xFF800000> : vector<2xf32>
    %61 = vector.multi_reduction <maximumf>, %60, %cst_35 [1] : vector<2x2xf32> to vector<2xf32>
    %62 = vector.shape_cast %61 : vector<2xf32> to vector<2x1xf32>
    %63 = vector.broadcast %62 : vector<2x1xf32> to vector<2x2xf32>
    %64 = arith.subf %60, %63 : vector<2x2xf32>
    %65 = math.exp %64 : vector<2x2xf32>
    %cst_36 = arith.constant dense<0.000000e+00> : vector<2xf32>
    %66 = vector.multi_reduction <add>, %65, %cst_36 [1] : vector<2x2xf32> to vector<2xf32>
    %67 = vector.shape_cast %66 : vector<2xf32> to vector<2x1xf32>
    %68 = tpu.reciprocal %67 {approx = true} : vector<2x1xf32> -> vector<2x1xf32>
    %69 = vector.broadcast %68 : vector<2x1xf32> to vector<2x2xf32>
    %70 = arith.mulf %65, %69 : vector<2x2xf32>
    %71 = vector.extract_strided_slice %25 {offsets = [0, 16], sizes = [2, 8], strides = [1, 1]} : vector<2x32xf32> to vector<2x8xf32>
    %cst_37 = arith.constant dense<0.000000e+00> : vector<2x8xf32>
    %72 = tpu.matmul %70, %71, %cst_37 {dimension_numbers = #tpu.dot_dimension_numbers<[1], [0], [0], [1], [0, 0, 1, 1], [], []>} : vector<2x2xf32>, vector<2x8xf32>, vector<2x8xf32> -> vector<2x8xf32>
    %c0_38 = arith.constant 0 : index
    %c16 = arith.constant 16 : index
    %73 = vector.load %arg12[%c0_38, %c16] : memref<2x32xf32, #tpu.memory_space<vmem>>, vector<2x8xf32>
    tpu.vector_store %arg12[%c0_38, %c16], %72 {strides = array<i32>} : memref<2x32xf32, #tpu.memory_space<vmem>>, vector<2x8xf32>,
    %74 = vector.extract_strided_slice %15 {offsets = [0, 24], sizes = [2, 8], strides = [1, 1]} : vector<2x32xf32> to vector<2x8xf32>
    %75 = vector.extract_strided_slice %20 {offsets = [0, 24], sizes = [2, 8], strides = [1, 1]} : vector<2x32xf32> to vector<2x8xf32>
    %cst_39 = arith.constant dense<0.000000e+00> : vector<2x2xf32>
    %76 = tpu.matmul %74, %75, %cst_39 {dimension_numbers = #tpu.dot_dimension_numbers<[1], [1], [0], [0], [0, 0, 1, 0], [], []>} : vector<2x8xf32>, vector<2x8xf32>, vector<2x2xf32> -> vector<2x2xf32>
    %cst_40 = arith.constant dense<0xFF800000> : vector<2xf32>
    %77 = vector.multi_reduction <maximumf>, %76, %cst_40 [1] : vector<2x2xf32> to vector<2xf32>
    %78 = vector.shape_cast %77 : vector<2xf32> to vector<2x1xf32>
    %79 = vector.broadcast %78 : vector<2x1xf32> to vector<2x2xf32>
    %80 = arith.subf %76, %79 : vector<2x2xf32>
    %81 = math.exp %80 : vector<2x2xf32>
    %cst_41 = arith.constant dense<0.000000e+00> : vector<2xf32>
    %82 = vector.multi_reduction <add>, %81, %cst_41 [1] : vector<2x2xf32> to vector<2xf32>
    %83 = vector.shape_cast %82 : vector<2xf32> to vector<2x1xf32>
    %84 = tpu.reciprocal %83 {approx = true} : vector<2x1xf32> -> vector<2x1xf32>
    %85 = vector.broadcast %84 : vector<2x1xf32> to vector<2x2xf32>
    %86 = arith.mulf %81, %85 : vector<2x2xf32>
    %87 = vector.extract_strided_slice %25 {offsets = [0, 24], sizes = [2, 8], strides = [1, 1]} : vector<2x32xf32> to vector<2x8xf32>
    %cst_42 = arith.constant dense<0.000000e+00> : vector<2x8xf32>
    %88 = tpu.matmul %86, %87, %cst_42 {dimension_numbers = #tpu.dot_dimension_numbers<[1], [0], [0], [1], [0, 0, 1, 1], [], []>} : vector<2x2xf32>, vector<2x8xf32>, vector<2x8xf32> -> vector<2x8xf32>
    %c0_43 = arith.constant 0 : index
    %c24 = arith.constant 24 : index
    %89 = vector.load %arg12[%c0_43, %c24] : memref<2x32xf32, #tpu.memory_space<vmem>>, vector<2x8xf32>
    tpu.vector_store %arg12[%c0_43, %c24], %88 {strides = array<i32>} : memref<2x32xf32, #tpu.memory_space<vmem>>, vector<2x8xf32>,
    %c0_44 = arith.constant 0 : index
    %c0_45 = arith.constant 0 : index
    %90 = vector.load %arg12[%c0_44, %c0_45] : memref<2x32xf32, #tpu.memory_space<vmem>>, vector<2x32xf32>
    %91 = arith.truncf %90 : vector<2x32xf32> to vector<2x32xbf16>
    %c0_46 = arith.constant 0 : index
    %c0_47 = arith.constant 0 : index
    %92 = vector.load %arg9[%c0_46, %c0_47] : memref<32x32xbf16, #tpu.memory_space<vmem>>, vector<32x32xbf16>
    %cst_48 = arith.constant dense<0.000000e+00> : vector<2x32xf32>
    %93 = tpu.matmul %91, %92, %cst_48 {dimension_numbers = #tpu.dot_dimension_numbers<[1], [0], [0], [1], [0, 0, 1, 1], [], []>} : vector<2x32xbf16>, vector<32x32xbf16>, vector<2x32xf32> -> vector<2x32xf32>
    %c0_49 = arith.constant 0 : index
    %c0_50 = arith.constant 0 : index
    %94 = vector.load %arg10[%c0_49, %c0_50] : memref<1x32xf32, #tpu.memory_space<vmem>>, vector<1x32xf32>
    %95 = vector.broadcast %94 : vector<1x32xf32> to vector<2x32xf32>
    %96 = arith.addf %93, %95 : vector<2x32xf32>
    %c0_51 = arith.constant 0 : index
    %c0_52 = arith.constant 0 : index
    %97 = vector.load %arg11[%c0_51, %c0_52] : memref<2x32xf32, #tpu.memory_space<vmem>>, vector<2x32xf32>
    tpu.vector_store %arg11[%c0_51, %c0_52], %96 {strides = array<i32>} : memref<2x32xf32, #tpu.memory_space<vmem>>, vector<2x32xf32>,
    return
  }
}

module attributes {stable_mosaic.version = 11 : i64} {
  func.func @lm_head_kernel(%arg0: i32, %arg1: memref<16x32xf32, #tpu.memory_space<vmem>>, %arg2: memref<128x32xbf16, #tpu.memory_space<vmem>>, %arg3: memref<16x128xf32, #tpu.memory_space<vmem>>) attributes {dimension_semantics = [#tpu.dimension_semantics<parallel>], iteration_bounds = array<i64: 1>, scalar_prefetch = 0 : i64, scratch_operands = 0 : i64, tpu.core_type = #tpu.core_type<tc>, window_params = [{pipeline_mode = #tpu.pipeline_mode<synchronous>, transform_indices = @transform_0, window_bounds = array<i64: 16, 32>}, {transform_indices = @transform_1, window_bounds = array<i64: 128, 32>}, {transform_indices = @transform_2, window_bounds = array<i64: 16, 128>}]} {
    %c0 = arith.constant 0 : index
    %c0_0 = arith.constant 0 : index
    %0 = vector.load %arg1[%c0, %c0_0] : memref<16x32xf32, #tpu.memory_space<vmem>>, vector<16x32xf32>
    %1 = arith.truncf %0 : vector<16x32xf32> to vector<16x32xbf16>
    %c0_1 = arith.constant 0 : index
    %c0_2 = arith.constant 0 : index
    %2 = vector.load %arg2[%c0_1, %c0_2] : memref<128x32xbf16, #tpu.memory_space<vmem>>, vector<128x32xbf16>
    %cst = arith.constant dense<0.000000e+00> : vector<16x128xf32>
    %3 = tpu.matmul %1, %2, %cst {dimension_numbers = #tpu.dot_dimension_numbers<[1], [1], [0], [0], [0, 0, 1, 0], [], []>} : vector<16x32xbf16>, vector<128x32xbf16>, vector<16x128xf32> -> vector<16x128xf32>
    %c0_3 = arith.constant 0 : index
    %c0_4 = arith.constant 0 : index
    %4 = vector.load %arg3[%c0_3, %c0_4] : memref<16x128xf32, #tpu.memory_space<vmem>>, vector<16x128xf32>
    tpu.vector_store %arg3[%c0_3, %c0_4], %3 {strides = array<i32>} : memref<16x128xf32, #tpu.memory_space<vmem>>, vector<16x128xf32>,
    return
  }
  func.func @transform_0(%arg0: i32) -> (i32, i32) {
    %c0_i32 = arith.constant 0 : i32
    %c0_i32_0 = arith.constant 0 : i32
    %c0_i32_1 = arith.constant 0 : i32
    return %c0_i32, %c0_i32_0 : i32, i32
  }
  func.func @transform_1(%arg0: i32) -> (i32, i32) {
    %c0_i32 = arith.constant 0 : i32
    %c0_i32_0 = arith.constant 0 : i32
    return %arg0, %c0_i32 : i32, i32
  }
  func.func @transform_2(%arg0: i32) -> (i32, i32) {
    %c0_i32 = arith.constant 0 : i32
    %c0_i32_0 = arith.constant 0 : i32
    return %c0_i32, %arg0 : i32, i32
  }
}

module attributes {stable_mosaic.version = 11 : i64} {
  func.func @decoder_stack_kernel(%arg0: i32, %arg1: i32, %arg2: memref<1x8x32xf32, #tpu.memory_space<vmem>>, %arg3: memref<1x1x8xf32, #tpu.memory_space<vmem>>, %arg4: memref<1x1x32xf32, #tpu.memory_space<vmem>>, %arg5: memref<1x1x32xf32, #tpu.memory_space<vmem>>, %arg6: memref<1x1x32xf32, #tpu.memory_space<vmem>>, %arg7: memref<1x32x96xbf16, #tpu.memory_space<vmem>>, %arg8: memref<1x1x96xf32, #tpu.memory_space<vmem>>, %arg9: memref<1x32x32xbf16, #tpu.memory_space<vmem>>, %arg10: memref<1x1x32xf32, #tpu.memory_space<vmem>>, %arg11: memref<1x32x32xbf16, #tpu.memory_space<vmem>>, %arg12: memref<1x1x32xf32, #tpu.memory_space<vmem>>, %arg13: memref<1x32x32xbf16, #tpu.memory_space<vmem>>, %arg14: memref<1x1x32xf32, #tpu.memory_space<vmem>>, %arg15: memref<1x1x32xf32, #tpu.memory_space<vmem>>, %arg16: memref<1x1x32xf32, #tpu.memory_space<vmem>>, %arg17: memref<1x32x64xbf16, #tpu.memory_space<vmem>>, %arg18: memref<1x1x64xf32, #tpu.memory_space<vmem>>, %arg19: memref<1x64x32xbf16, #tpu.memory_space<vmem>>, %arg20: memref<1x1x32xf32, #tpu.memory_space<vmem>>, %arg21: memref<1x32xf32, #tpu.memory_space<vmem>>, %arg22: memref<1x32xf32, #tpu.memory_space<vmem>>, %arg23: memref<1x8x32xf32, #tpu.memory_space<vmem>>, %arg24: memref<8x32xf32, #tpu.memory_space<vmem>>, %arg25: memref<8x8xf32, #tpu.memory_space<vmem>>, %arg26: memref<8x32xf32, #tpu.memory_space<vmem>>) attributes {dimension_semantics = [#tpu.dimension_semantics<parallel>, #tpu.dimension_semantics<arbitrary>], iteration_bounds = array<i64: 2, 2>, scalar_prefetch = 0 : i64, scratch_operands = 3 : i64, tpu.core_type = #tpu.core_type<tc>, window_params = [{transform_indices = @transform_0, window_bounds = array<i64: 1, 8, 32>}, {transform_indices = @transform_1, window_bounds = array<i64: 1, 1, 8>}, {transform_indices = @transform_2, window_bounds = array<i64: 1, 1, 32>}, {transform_indices = @transform_3, window_bounds = array<i64: 1, 1, 32>}, {transform_indices = @transform_4, window_bounds = array<i64: 1, 1, 32>}, {transform_indices = @transform_5, window_bounds = array<i64: 1, 32, 96>}, {transform_indices = @transform_6, window_bounds = array<i64: 1, 1, 96>}, {transform_indices = @transform_7, window_bounds = array<i64: 1, 32, 32>}, {transform_indices = @transform_8, window_bounds = array<i64: 1, 1, 32>}, {transform_indices = @transform_9, window_bounds = array<i64: 1, 32, 32>}, {transform_indices = @transform_10, window_bounds = array<i64: 1, 1, 32>}, {transform_indices = @transform_11, window_bounds = array<i64: 1, 32, 32>}, {transform_indices = @transform_12, window_bounds = array<i64: 1, 1, 32>}, {transform_indices = @transform_13, window_bounds = array<i64: 1, 1, 32>}, {transform_indices = @transform_14, window_bounds = array<i64: 1, 1, 32>}, {transform_indices = @transform_15, window_bounds = array<i64: 1, 32, 64>}, {transform_indices = @transform_16, window_bounds = array<i64: 1, 1, 64>}, {transform_indices = @transform_17, window_bounds = array<i64: 1, 64, 32>}, {transform_indices = @transform_18, window_bounds = array<i64: 1, 1, 32>}, {pipeline_mode = #tpu.pipeline_mode<synchronous>, transform_indices = @transform_19, window_bounds = array<i64: 1, 32>}, {pipeline_mode = #tpu.pipeline_mode<synchronous>, transform_indices = @transform_20, window_bounds = array<i64: 1, 32>}, {transform_indices = @transform_21, window_bounds = array<i64: 1, 8, 32>}]} {
    %c0_i32 = arith.constant 0 : i32
    %0 = arith.cmpi eq, %arg1, %c0_i32 : i32
    %1 = arith.extui %0 : i1 to i32
    %c0_i32_0 = arith.constant 0 : i32
    %2 = arith.cmpi ne, %1, %c0_i32_0 : i32
    scf.if %2 {
      %c0_100 = arith.constant 0 : index
      %c0_101 = arith.constant 0 : index
      %c0_102 = arith.constant 0 : index
      %198 = vector.load %arg2[%c0_100, %c0_101, %c0_102] : memref<1x8x32xf32, #tpu.memory_space<vmem>>, vector<1x8x32xf32>
      %199 = vector.shape_cast %198 : vector<1x8x32xf32> to vector<8x32xf32>
      %c0_103 = arith.constant 0 : index
      %c0_104 = arith.constant 0 : index
      %200 = vector.load %arg24[%c0_103, %c0_104] : memref<8x32xf32, #tpu.memory_space<vmem>>, vector<8x32xf32>
      tpu.vector_store %arg24[%c0_103, %c0_104], %199 {strides = array<i32>} : memref<8x32xf32, #tpu.memory_space<vmem>>, vector<8x32xf32>,
      %201 = tpu.iota {dimensions = array<i32: 0>} : vector<8x8xi32>
      %202 = tpu.iota {dimensions = array<i32: 1>} : vector<8x8xi32>
      %203 = arith.cmpi sge, %201, %202 : vector<8x8xi32>
      %cst_105 = arith.constant 0.000000e+00 : f32
      %cst_106 = arith.constant -1.000000e+09 : f32
      %204 = vector.broadcast %cst_105 : f32 to vector<8x8xf32>
      %205 = vector.broadcast %cst_106 : f32 to vector<8x8xf32>
      %206 = arith.select %203, %204, %205 : vector<8x8xi1>, vector<8x8xf32>
      %c0_107 = arith.constant 0 : index
      %c0_108 = arith.constant 0 : index
      %c0_109 = arith.constant 0 : index
      %207 = vector.load %arg3[%c0_107, %c0_108, %c0_109] : memref<1x1x8xf32, #tpu.memory_space<vmem>>, vector<1x1x8xf32>
      %208 = vector.shape_cast %207 : vector<1x1x8xf32> to vector<1x8xf32>
      %cst_110 = arith.constant 1.000000e+00 : f32
      %209 = vector.broadcast %cst_110 : f32 to vector<1x8xf32>
      %210 = arith.subf %209, %208 : vector<1x8xf32>
      %cst_111 = arith.constant -1.000000e+09 : f32
      %211 = vector.broadcast %cst_111 : f32 to vector<1x8xf32>
      %212 = arith.mulf %210, %211 : vector<1x8xf32>
      %213 = vector.broadcast %212 : vector<1x8xf32> to vector<8x8xf32>
      %214 = arith.addf %206, %213 : vector<8x8xf32>
      %c0_112 = arith.constant 0 : index
      %c0_113 = arith.constant 0 : index
      %215 = vector.load %arg25[%c0_112, %c0_113] : memref<8x8xf32, #tpu.memory_space<vmem>>, vector<8x8xf32>
      tpu.vector_store %arg25[%c0_112, %c0_113], %214 {strides = array<i32>} : memref<8x8xf32, #tpu.memory_space<vmem>>, vector<8x8xf32>,
    } else {
    }
    %c0 = arith.constant 0 : index
    %c0_1 = arith.constant 0 : index
    %3 = vector.load %arg24[%c0, %c0_1] : memref<8x32xf32, #tpu.memory_space<vmem>>, vector<8x32xf32>
    %c0_2 = arith.constant 0 : index
    %c0_3 = arith.constant 0 : index
    %c0_4 = arith.constant 0 : index
    %4 = vector.load %arg5[%c0_2, %c0_3, %c0_4] : memref<1x1x32xf32, #tpu.memory_space<vmem>>, vector<1x1x32xf32>
    %5 = vector.shape_cast %4 : vector<1x1x32xf32> to vector<1x32xf32>
    %c0_5 = arith.constant 0 : index
    %c0_6 = arith.constant 0 : index
    %c0_7 = arith.constant 0 : index
    %6 = vector.load %arg6[%c0_5, %c0_6, %c0_7] : memref<1x1x32xf32, #tpu.memory_space<vmem>>, vector<1x1x32xf32>
    %7 = vector.shape_cast %6 : vector<1x1x32xf32> to vector<1x32xf32>
    %cst = arith.constant dense<0.000000e+00> : vector<8xf32>
    %8 = vector.multi_reduction <add>, %3, %cst [1] : vector<8x32xf32> to vector<8xf32>
    %9 = vector.shape_cast %8 : vector<8xf32> to vector<8x1xf32>
    %cst_8 = arith.constant 3.200000e+01 : f32
    %10 = vector.broadcast %cst_8 : f32 to vector<8x1xf32>
    %11 = arith.divf %9, %10 : vector<8x1xf32>
    %12 = vector.broadcast %11 : vector<8x1xf32> to vector<8x32xf32>
    %13 = arith.subf %3, %12 : vector<8x32xf32>
    %14 = arith.mulf %13, %13 : vector<8x32xf32>
    %cst_9 = arith.constant dense<0.000000e+00> : vector<8xf32>
    %15 = vector.multi_reduction <add>, %14, %cst_9 [1] : vector<8x32xf32> to vector<8xf32>
    %16 = vector.shape_cast %15 : vector<8xf32> to vector<8x1xf32>
    %cst_10 = arith.constant 3.200000e+01 : f32
    %17 = vector.broadcast %cst_10 : f32 to vector<8x1xf32>
    %18 = arith.divf %16, %17 : vector<8x1xf32>
    %19 = vector.broadcast %11 : vector<8x1xf32> to vector<8x32xf32>
    %20 = arith.subf %3, %19 : vector<8x32xf32>
    %cst_11 = arith.constant 9.99999974E-6 : f32
    %21 = vector.broadcast %cst_11 : f32 to vector<8x1xf32>
    %22 = arith.addf %18, %21 : vector<8x1xf32>
    %23 = math.rsqrt %22 : vector<8x1xf32>
    %24 = vector.broadcast %23 : vector<8x1xf32> to vector<8x32xf32>
    %25 = arith.mulf %20, %24 : vector<8x32xf32>
    %26 = vector.broadcast %5 : vector<1x32xf32> to vector<8x32xf32>
    %27 = arith.mulf %25, %26 : vector<8x32xf32>
    %28 = vector.broadcast %7 : vector<1x32xf32> to vector<8x32xf32>
    %29 = arith.addf %27, %28 : vector<8x32xf32>
    %30 = arith.truncf %29 : vector<8x32xf32> to vector<8x32xbf16>
    %c0_12 = arith.constant 0 : index
    %c0_13 = arith.constant 0 : index
    %c0_14 = arith.constant 0 : index
    %31 = vector.load %arg7[%c0_12, %c0_13, %c0_14] : memref<1x32x96xbf16, #tpu.memory_space<vmem>>, vector<1x32x96xbf16>
    %32 = vector.shape_cast %31 : vector<1x32x96xbf16> to vector<32x96xbf16>
    %cst_15 = arith.constant dense<0.000000e+00> : vector<8x96xf32>
    %33 = tpu.matmul %30, %32, %cst_15 {dimension_numbers = #tpu.dot_dimension_numbers<[1], [0], [0], [1], [0, 0, 1, 1], [], []>} : vector<8x32xbf16>, vector<32x96xbf16>, vector<8x96xf32> -> vector<8x96xf32>
    %c0_16 = arith.constant 0 : index
    %c0_17 = arith.constant 0 : index
    %c0_18 = arith.constant 0 : index
    %34 = vector.load %arg8[%c0_16, %c0_17, %c0_18] : memref<1x1x96xf32, #tpu.memory_space<vmem>>, vector<1x1x96xf32>
    %35 = vector.shape_cast %34 : vector<1x1x96xf32> to vector<1x96xf32>
    %36 = vector.broadcast %35 : vector<1x96xf32> to vector<8x96xf32>
    %37 = arith.addf %33, %36 : vector<8x96xf32>
    %38 = vector.extract_strided_slice %37 {offsets = [0, 0], sizes = [8, 32], strides = [1, 1]} : vector<8x96xf32> to vector<8x32xf32>
    %39 = vector.extract_strided_slice %37 {offsets = [0, 32], sizes = [8, 32], strides = [1, 1]} : vector<8x96xf32> to vector<8x32xf32>
    %40 = vector.extract_strided_slice %37 {offsets = [0, 64], sizes = [8, 32], strides = [1, 1]} : vector<8x96xf32> to vector<8x32xf32>
    %c0_19 = arith.constant 0 : index
    %c0_20 = arith.constant 0 : index
    %41 = vector.load %arg25[%c0_19, %c0_20] : memref<8x8xf32, #tpu.memory_space<vmem>>, vector<8x8xf32>
    %42 = vector.extract_strided_slice %38 {offsets = [0, 0], sizes = [8, 8], strides = [1, 1]} : vector<8x32xf32> to vector<8x8xf32>
    %43 = vector.extract_strided_slice %39 {offsets = [0, 0], sizes = [8, 8], strides = [1, 1]} : vector<8x32xf32> to vector<8x8xf32>
    %cst_21 = arith.constant dense<0.000000e+00> : vector<8x8xf32>
    %44 = tpu.matmul %42, %43, %cst_21 {dimension_numbers = #tpu.dot_dimension_numbers<[1], [1], [0], [0], [0, 0, 1, 0], [], []>} : vector<8x8xf32>, vector<8x8xf32>, vector<8x8xf32> -> vector<8x8xf32>
    %45 = arith.addf %44, %41 : vector<8x8xf32>
    %cst_22 = arith.constant dense<0xFF800000> : vector<8xf32>
    %46 = vector.multi_reduction <maximumf>, %45, %cst_22 [1] : vector<8x8xf32> to vector<8xf32>
    %47 = vector.shape_cast %46 : vector<8xf32> to vector<8x1xf32>
    %48 = vector.broadcast %47 : vector<8x1xf32> to vector<8x8xf32>
    %49 = arith.subf %45, %48 : vector<8x8xf32>
    %50 = math.exp %49 : vector<8x8xf32>
    %cst_23 = arith.constant dense<0.000000e+00> : vector<8xf32>
    %51 = vector.multi_reduction <add>, %50, %cst_23 [1] : vector<8x8xf32> to vector<8xf32>
    %52 = vector.shape_cast %51 : vector<8xf32> to vector<8x1xf32>
    %53 = tpu.reciprocal %52 {approx = true} : vector<8x1xf32> -> vector<8x1xf32>
    %54 = vector.broadcast %53 : vector<8x1xf32> to vector<8x8xf32>
    %55 = arith.mulf %50, %54 : vector<8x8xf32>
    %56 = vector.extract_strided_slice %40 {offsets = [0, 0], sizes = [8, 8], strides = [1, 1]} : vector<8x32xf32> to vector<8x8xf32>
    %cst_24 = arith.constant dense<0.000000e+00> : vector<8x8xf32>
    %57 = tpu.matmul %55, %56, %cst_24 {dimension_numbers = #tpu.dot_dimension_numbers<[1], [0], [0], [1], [0, 0, 1, 1], [], []>} : vector<8x8xf32>, vector<8x8xf32>, vector<8x8xf32> -> vector<8x8xf32>
    %c0_25 = arith.constant 0 : index
    %c0_26 = arith.constant 0 : index
    %58 = vector.load %arg26[%c0_25, %c0_26] : memref<8x32xf32, #tpu.memory_space<vmem>>, vector<8x8xf32>
    tpu.vector_store %arg26[%c0_25, %c0_26], %57 {strides = array<i32>} : memref<8x32xf32, #tpu.memory_space<vmem>>, vector<8x8xf32>,
    %59 = vector.extract_strided_slice %38 {offsets = [0, 8], sizes = [8, 8], strides = [1, 1]} : vector<8x32xf32> to vector<8x8xf32>
    %60 = vector.extract_strided_slice %39 {offsets = [0, 8], sizes = [8, 8], strides = [1, 1]} : vector<8x32xf32> to vector<8x8xf32>
    %cst_27 = arith.constant dense<0.000000e+00> : vector<8x8xf32>
    %61 = tpu.matmul %59, %60, %cst_27 {dimension_numbers = #tpu.dot_dimension_numbers<[1], [1], [0], [0], [0, 0, 1, 0], [], []>} : vector<8x8xf32>, vector<8x8xf32>, vector<8x8xf32> -> vector<8x8xf32>
    %62 = arith.addf %61, %41 : vector<8x8xf32>
    %cst_28 = arith.constant dense<0xFF800000> : vector<8xf32>
    %63 = vector.multi_reduction <maximumf>, %62, %cst_28 [1] : vector<8x8xf32> to vector<8xf32>
    %64 = vector.shape_cast %63 : vector<8xf32> to vector<8x1xf32>
    %65 = vector.broadcast %64 : vector<8x1xf32> to vector<8x8xf32>
    %66 = arith.subf %62, %65 : vector<8x8xf32>
    %67 = math.exp %66 : vector<8x8xf32>
    %cst_29 = arith.constant dense<0.000000e+00> : vector<8xf32>
    %68 = vector.multi_reduction <add>, %67, %cst_29 [1] : vector<8x8xf32> to vector<8xf32>
    %69 = vector.shape_cast %68 : vector<8xf32> to vector<8x1xf32>
    %70 = tpu.reciprocal %69 {approx = true} : vector<8x1xf32> -> vector<8x1xf32>
    %71 = vector.broadcast %70 : vector<8x1xf32> to vector<8x8xf32>
    %72 = arith.mulf %67, %71 : vector<8x8xf32>
    %73 = vector.extract_strided_slice %40 {offsets = [0, 8], sizes = [8, 8], strides = [1, 1]} : vector<8x32xf32> to vector<8x8xf32>
    %cst_30 = arith.constant dense<0.000000e+00> : vector<8x8xf32>
    %74 = tpu.matmul %72, %73, %cst_30 {dimension_numbers = #tpu.dot_dimension_numbers<[1], [0], [0], [1], [0, 0, 1, 1], [], []>} : vector<8x8xf32>, vector<8x8xf32>, vector<8x8xf32> -> vector<8x8xf32>
    %c0_31 = arith.constant 0 : index
    %c8 = arith.constant 8 : index
    %75 = vector.load %arg26[%c0_31, %c8] : memref<8x32xf32, #tpu.memory_space<vmem>>, vector<8x8xf32>
    tpu.vector_store %arg26[%c0_31, %c8], %74 {strides = array<i32>} : memref<8x32xf32, #tpu.memory_space<vmem>>, vector<8x8xf32>,
    %76 = vector.extract_strided_slice %38 {offsets = [0, 16], sizes = [8, 8], strides = [1, 1]} : vector<8x32xf32> to vector<8x8xf32>
    %77 = vector.extract_strided_slice %39 {offsets = [0, 16], sizes = [8, 8], strides = [1, 1]} : vector<8x32xf32> to vector<8x8xf32>
    %cst_32 = arith.constant dense<0.000000e+00> : vector<8x8xf32>
    %78 = tpu.matmul %76, %77, %cst_32 {dimension_numbers = #tpu.dot_dimension_numbers<[1], [1], [0], [0], [0, 0, 1, 0], [], []>} : vector<8x8xf32>, vector<8x8xf32>, vector<8x8xf32> -> vector<8x8xf32>
    %79 = arith.addf %78, %41 : vector<8x8xf32>
    %cst_33 = arith.constant dense<0xFF800000> : vector<8xf32>
    %80 = vector.multi_reduction <maximumf>, %79, %cst_33 [1] : vector<8x8xf32> to vector<8xf32>
    %81 = vector.shape_cast %80 : vector<8xf32> to vector<8x1xf32>
    %82 = vector.broadcast %81 : vector<8x1xf32> to vector<8x8xf32>
    %83 = arith.subf %79, %82 : vector<8x8xf32>
    %84 = math.exp %83 : vector<8x8xf32>
    %cst_34 = arith.constant dense<0.000000e+00> : vector<8xf32>
    %85 = vector.multi_reduction <add>, %84, %cst_34 [1] : vector<8x8xf32> to vector<8xf32>
    %86 = vector.shape_cast %85 : vector<8xf32> to vector<8x1xf32>
    %87 = tpu.reciprocal %86 {approx = true} : vector<8x1xf32> -> vector<8x1xf32>
    %88 = vector.broadcast %87 : vector<8x1xf32> to vector<8x8xf32>
    %89 = arith.mulf %84, %88 : vector<8x8xf32>
    %90 = vector.extract_strided_slice %40 {offsets = [0, 16], sizes = [8, 8], strides = [1, 1]} : vector<8x32xf32> to vector<8x8xf32>
    %cst_35 = arith.constant dense<0.000000e+00> : vector<8x8xf32>
    %91 = tpu.matmul %89, %90, %cst_35 {dimension_numbers = #tpu.dot_dimension_numbers<[1], [0], [0], [1], [0, 0, 1, 1], [], []>} : vector<8x8xf32>, vector<8x8xf32>, vector<8x8xf32> -> vector<8x8xf32>
    %c0_36 = arith.constant 0 : index
    %c16 = arith.constant 16 : index
    %92 = vector.load %arg26[%c0_36, %c16] : memref<8x32xf32, #tpu.memory_space<vmem>>, vector<8x8xf32>
    tpu.vector_store %arg26[%c0_36, %c16], %91 {strides = array<i32>} : memref<8x32xf32, #tpu.memory_space<vmem>>, vector<8x8xf32>,
    %93 = vector.extract_strided_slice %38 {offsets = [0, 24], sizes = [8, 8], strides = [1, 1]} : vector<8x32xf32> to vector<8x8xf32>
    %94 = vector.extract_strided_slice %39 {offsets = [0, 24], sizes = [8, 8], strides = [1, 1]} : vector<8x32xf32> to vector<8x8xf32>
    %cst_37 = arith.constant dense<0.000000e+00> : vector<8x8xf32>
    %95 = tpu.matmul %93, %94, %cst_37 {dimension_numbers = #tpu.dot_dimension_numbers<[1], [1], [0], [0], [0, 0, 1, 0], [], []>} : vector<8x8xf32>, vector<8x8xf32>, vector<8x8xf32> -> vector<8x8xf32>
    %96 = arith.addf %95, %41 : vector<8x8xf32>
    %cst_38 = arith.constant dense<0xFF800000> : vector<8xf32>
    %97 = vector.multi_reduction <maximumf>, %96, %cst_38 [1] : vector<8x8xf32> to vector<8xf32>
    %98 = vector.shape_cast %97 : vector<8xf32> to vector<8x1xf32>
    %99 = vector.broadcast %98 : vector<8x1xf32> to vector<8x8xf32>
    %100 = arith.subf %96, %99 : vector<8x8xf32>
    %101 = math.exp %100 : vector<8x8xf32>
    %cst_39 = arith.constant dense<0.000000e+00> : vector<8xf32>
    %102 = vector.multi_reduction <add>, %101, %cst_39 [1] : vector<8x8xf32> to vector<8xf32>
    %103 = vector.shape_cast %102 : vector<8xf32> to vector<8x1xf32>
    %104 = tpu.reciprocal %103 {approx = true} : vector<8x1xf32> -> vector<8x1xf32>
    %105 = vector.broadcast %104 : vector<8x1xf32> to vector<8x8xf32>
    %106 = arith.mulf %101, %105 : vector<8x8xf32>
    %107 = vector.extract_strided_slice %40 {offsets = [0, 24], sizes = [8, 8], strides = [1, 1]} : vector<8x32xf32> to vector<8x8xf32>
    %cst_40 = arith.constant dense<0.000000e+00> : vector<8x8xf32>
    %108 = tpu.matmul %106, %107, %cst_40 {dimension_numbers = #tpu.dot_dimension_numbers<[1], [0], [0], [1], [0, 0, 1, 1], [], []>} : vector<8x8xf32>, vector<8x8xf32>, vector<8x8xf32> -> vector<8x8xf32>
    %c0_41 = arith.constant 0 : index
    %c24 = arith.constant 24 : index
    %109 = vector.load %arg26[%c0_41, %c24] : memref<8x32xf32, #tpu.memory_space<vmem>>, vector<8x8xf32>
    tpu.vector_store %arg26[%c0_41, %c24], %108 {strides = array<i32>} : memref<8x32xf32, #tpu.memory_space<vmem>>, vector<8x8xf32>,
    %c0_42 = arith.constant 0 : index
    %c0_43 = arith.constant 0 : index
    %110 = vector.load %arg26[%c0_42, %c0_43] : memref<8x32xf32, #tpu.memory_space<vmem>>, vector<8x32xf32>
    %111 = arith.truncf %110 : vector<8x32xf32> to vector<8x32xbf16>
    %c0_44 = arith.constant 0 : index
    %c0_45 = arith.constant 0 : index
    %c0_46 = arith.constant 0 : index
    %112 = vector.load %arg9[%c0_44, %c0_45, %c0_46] : memref<1x32x32xbf16, #tpu.memory_space<vmem>>, vector<1x32x32xbf16>
    %113 = vector.shape_cast %112 : vector<1x32x32xbf16> to vector<32x32xbf16>
    %cst_47 = arith.constant dense<0.000000e+00> : vector<8x32xf32>
    %114 = tpu.matmul %111, %113, %cst_47 {dimension_numbers = #tpu.dot_dimension_numbers<[1], [0], [0], [1], [0, 0, 1, 1], [], []>} : vector<8x32xbf16>, vector<32x32xbf16>, vector<8x32xf32> -> vector<8x32xf32>
    %115 = arith.addf %3, %114 : vector<8x32xf32>
    %c0_48 = arith.constant 0 : index
    %c0_49 = arith.constant 0 : index
    %c0_50 = arith.constant 0 : index
    %116 = vector.load %arg10[%c0_48, %c0_49, %c0_50] : memref<1x1x32xf32, #tpu.memory_space<vmem>>, vector<1x1x32xf32>
    %117 = vector.shape_cast %116 : vector<1x1x32xf32> to vector<1x32xf32>
    %118 = vector.broadcast %117 : vector<1x32xf32> to vector<8x32xf32>
    %119 = arith.addf %115, %118 : vector<8x32xf32>
    %c0_51 = arith.constant 0 : index
    %c0_52 = arith.constant 0 : index
    %c0_53 = arith.constant 0 : index
    %120 = vector.load %arg4[%c0_51, %c0_52, %c0_53] : memref<1x1x32xf32, #tpu.memory_space<vmem>>, vector<1x1x32xf32>
    %121 = vector.shape_cast %120 : vector<1x1x32xf32> to vector<1x32xf32>
    %122 = arith.truncf %121 : vector<1x32xf32> to vector<1x32xbf16>
    %c0_54 = arith.constant 0 : index
    %c0_55 = arith.constant 0 : index
    %c0_56 = arith.constant 0 : index
    %123 = vector.load %arg11[%c0_54, %c0_55, %c0_56] : memref<1x32x32xbf16, #tpu.memory_space<vmem>>, vector<1x32x32xbf16>
    %124 = vector.shape_cast %123 : vector<1x32x32xbf16> to vector<32x32xbf16>
    %cst_57 = arith.constant dense<0.000000e+00> : vector<1x32xf32>
    %125 = tpu.matmul %122, %124, %cst_57 {dimension_numbers = #tpu.dot_dimension_numbers<[1], [0], [0], [1], [0, 0, 1, 1], [], []>} : vector<1x32xbf16>, vector<32x32xbf16>, vector<1x32xf32> -> vector<1x32xf32>
    %c0_58 = arith.constant 0 : index
    %c0_59 = arith.constant 0 : index
    %c0_60 = arith.constant 0 : index
    %126 = vector.load %arg12[%c0_58, %c0_59, %c0_60] : memref<1x1x32xf32, #tpu.memory_space<vmem>>, vector<1x1x32xf32>
    %127 = vector.shape_cast %126 : vector<1x1x32xf32> to vector<1x32xf32>
    %128 = arith.addf %125, %127 : vector<1x32xf32>
    %129 = arith.truncf %128 : vector<1x32xf32> to vector<1x32xbf16>
    %c0_61 = arith.constant 0 : index
    %c0_62 = arith.constant 0 : index
    %c0_63 = arith.constant 0 : index
    %130 = vector.load %arg13[%c0_61, %c0_62, %c0_63] : memref<1x32x32xbf16, #tpu.memory_space<vmem>>, vector<1x32x32xbf16>
    %131 = vector.shape_cast %130 : vector<1x32x32xbf16> to vector<32x32xbf16>
    %cst_64 = arith.constant dense<0.000000e+00> : vector<1x32xf32>
    %132 = tpu.matmul %129, %131, %cst_64 {dimension_numbers = #tpu.dot_dimension_numbers<[1], [0], [0], [1], [0, 0, 1, 1], [], []>} : vector<1x32xbf16>, vector<32x32xbf16>, vector<1x32xf32> -> vector<1x32xf32>
    %c0_65 = arith.constant 0 : index
    %c0_66 = arith.constant 0 : index
    %c0_67 = arith.constant 0 : index
    %133 = vector.load %arg14[%c0_65, %c0_66, %c0_67] : memref<1x1x32xf32, #tpu.memory_space<vmem>>, vector<1x1x32xf32>
    %134 = vector.shape_cast %133 : vector<1x1x32xf32> to vector<1x32xf32>
    %135 = arith.addf %132, %134 : vector<1x32xf32>
    %136 = vector.broadcast %135 : vector<1x32xf32> to vector<8x32xf32>
    %137 = arith.addf %119, %136 : vector<8x32xf32>
    %c0_68 = arith.constant 0 : index
    %c0_69 = arith.constant 0 : index
    %c0_70 = arith.constant 0 : index
    %138 = vector.load %arg15[%c0_68, %c0_69, %c0_70] : memref<1x1x32xf32, #tpu.memory_space<vmem>>, vector<1x1x32xf32>
    %139 = vector.shape_cast %138 : vector<1x1x32xf32> to vector<1x32xf32>
    %c0_71 = arith.constant 0 : index
    %c0_72 = arith.constant 0 : index
    %c0_73 = arith.constant 0 : index
    %140 = vector.load %arg16[%c0_71, %c0_72, %c0_73] : memref<1x1x32xf32, #tpu.memory_space<vmem>>, vector<1x1x32xf32>
    %141 = vector.shape_cast %140 : vector<1x1x32xf32> to vector<1x32xf32>
    %cst_74 = arith.constant dense<0.000000e+00> : vector<8xf32>
    %142 = vector.multi_reduction <add>, %137, %cst_74 [1] : vector<8x32xf32> to vector<8xf32>
    %143 = vector.shape_cast %142 : vector<8xf32> to vector<8x1xf32>
    %cst_75 = arith.constant 3.200000e+01 : f32
    %144 = vector.broadcast %cst_75 : f32 to vector<8x1xf32>
    %145 = arith.divf %143, %144 : vector<8x1xf32>
    %146 = vector.broadcast %145 : vector<8x1xf32> to vector<8x32xf32>
    %147 = arith.subf %137, %146 : vector<8x32xf32>
    %148 = arith.mulf %147, %147 : vector<8x32xf32>
    %cst_76 = arith.constant dense<0.000000e+00> : vector<8xf32>
    %149 = vector.multi_reduction <add>, %148, %cst_76 [1] : vector<8x32xf32> to vector<8xf32>
    %150 = vector.shape_cast %149 : vector<8xf32> to vector<8x1xf32>
    %cst_77 = arith.constant 3.200000e+01 : f32
    %151 = vector.broadcast %cst_77 : f32 to vector<8x1xf32>
    %152 = arith.divf %150, %151 : vector<8x1xf32>
    %153 = vector.broadcast %145 : vector<8x1xf32> to vector<8x32xf32>
    %154 = arith.subf %137, %153 : vector<8x32xf32>
    %cst_78 = arith.constant 9.99999974E-6 : f32
    %155 = vector.broadcast %cst_78 : f32 to vector<8x1xf32>
    %156 = arith.addf %152, %155 : vector<8x1xf32>
    %157 = math.rsqrt %156 : vector<8x1xf32>
    %158 = vector.broadcast %157 : vector<8x1xf32> to vector<8x32xf32>
    %159 = arith.mulf %154, %158 : vector<8x32xf32>
    %160 = vector.broadcast %139 : vector<1x32xf32> to vector<8x32xf32>
    %161 = arith.mulf %159, %160 : vector<8x32xf32>
    %162 = vector.broadcast %141 : vector<1x32xf32> to vector<8x32xf32>
    %163 = arith.addf %161, %162 : vector<8x32xf32>
    %164 = arith.truncf %163 : vector<8x32xf32> to vector<8x32xbf16>
    %c0_79 = arith.constant 0 : index
    %c0_80 = arith.constant 0 : index
    %c0_81 = arith.constant 0 : index
    %165 = vector.load %arg17[%c0_79, %c0_80, %c0_81] : memref<1x32x64xbf16, #tpu.memory_space<vmem>>, vector<1x32x64xbf16>
    %166 = vector.shape_cast %165 : vector<1x32x64xbf16> to vector<32x64xbf16>
    %cst_82 = arith.constant dense<0.000000e+00> : vector<8x64xf32>
    %167 = tpu.matmul %164, %166, %cst_82 {dimension_numbers = #tpu.dot_dimension_numbers<[1], [0], [0], [1], [0, 0, 1, 1], [], []>} : vector<8x32xbf16>, vector<32x64xbf16>, vector<8x64xf32> -> vector<8x64xf32>
    %c0_83 = arith.constant 0 : index
    %c0_84 = arith.constant 0 : index
    %c0_85 = arith.constant 0 : index
    %168 = vector.load %arg18[%c0_83, %c0_84, %c0_85] : memref<1x1x64xf32, #tpu.memory_space<vmem>>, vector<1x1x64xf32>
    %169 = vector.shape_cast %168 : vector<1x1x64xf32> to vector<1x64xf32>
    %170 = vector.broadcast %169 : vector<1x64xf32> to vector<8x64xf32>
    %171 = arith.addf %167, %170 : vector<8x64xf32>
    %cst_86 = arith.constant 5.000000e-01 : f32
    %172 = vector.broadcast %cst_86 : f32 to vector<8x64xf32>
    %173 = arith.mulf %172, %171 : vector<8x64xf32>
    %cst_87 = arith.constant 4.471500e-02 : f32
    %174 = vector.broadcast %cst_87 : f32 to vector<8x64xf32>
    %175 = arith.mulf %174, %171 : vector<8x64xf32>
    %176 = arith.mulf %175, %171 : vector<8x64xf32>
    %177 = arith.mulf %176, %171 : vector<8x64xf32>
    %178 = arith.addf %171, %177 : vector<8x64xf32>
    %cst_88 = arith.constant 0.797884583 : f32
    %179 = vector.broadcast %cst_88 : f32 to vector<8x64xf32>
    %180 = arith.mulf %179, %178 : vector<8x64xf32>
    %181 = math.tanh %180 : vector<8x64xf32>
    %cst_89 = arith.constant 1.000000e+00 : f32
    %182 = vector.broadcast %cst_89 : f32 to vector<8x64xf32>
    %183 = arith.addf %182, %181 : vector<8x64xf32>
    %184 = arith.mulf %173, %183 : vector<8x64xf32>
    %185 = arith.truncf %184 : vector<8x64xf32> to vector<8x64xbf16>
    %c0_90 = arith.constant 0 : index
    %c0_91 = arith.constant 0 : index
    %c0_92 = arith.constant 0 : index
    %186 = vector.load %arg19[%c0_90, %c0_91, %c0_92] : memref<1x64x32xbf16, #tpu.memory_space<vmem>>, vector<1x64x32xbf16>
    %187 = vector.shape_cast %186 : vector<1x64x32xbf16> to vector<64x32xbf16>
    %cst_93 = arith.constant dense<0.000000e+00> : vector<8x32xf32>
    %188 = tpu.matmul %185, %187, %cst_93 {dimension_numbers = #tpu.dot_dimension_numbers<[1], [0], [0], [1], [0, 0, 1, 1], [], []>} : vector<8x64xbf16>, vector<64x32xbf16>, vector<8x32xf32> -> vector<8x32xf32>
    %189 = arith.addf %137, %188 : vector<8x32xf32>
    %c0_94 = arith.constant 0 : index
    %c0_95 = arith.constant 0 : index
    %c0_96 = arith.constant 0 : index
    %190 = vector.load %arg20[%c0_94, %c0_95, %c0_96] : memref<1x1x32xf32, #tpu.memory_space<vmem>>, vector<1x1x32xf32>
    %191 = vector.shape_cast %190 : vector<1x1x32xf32> to vector<1x32xf32>
    %192 = vector.broadcast %191 : vector<1x32xf32> to vector<8x32xf32>
    %193 = arith.addf %189, %192 : vector<8x32xf32>
    %c0_97 = arith.constant 0 : index
    %c0_98 = arith.constant 0 : index
    %194 = vector.load %arg24[%c0_97, %c0_98] : memref<8x32xf32, #tpu.memory_space<vmem>>, vector<8x32xf32>
    tpu.vector_store %arg24[%c0_97, %c0_98], %193 {strides = array<i32>} : memref<8x32xf32, #tpu.memory_space<vmem>>, vector<8x32xf32>,
    %c1_i32 = arith.constant 1 : i32
    %195 = arith.cmpi eq, %arg1, %c1_i32 : i32
    %196 = arith.extui %195 : i1 to i32
    %c0_i32_99 = arith.constant 0 : i32
    %197 = arith.cmpi ne, %196, %c0_i32_99 : i32
    scf.if %197 {
      %c0_100 = arith.constant 0 : index
      %c0_101 = arith.constant 0 : index
      %198 = vector.load %arg21[%c0_100, %c0_101] : memref<1x32xf32, #tpu.memory_space<vmem>>, vector<1x32xf32>
      %c0_102 = arith.constant 0 : index
      %c0_103 = arith.constant 0 : index
      %199 = vector.load %arg22[%c0_102, %c0_103] : memref<1x32xf32, #tpu.memory_space<vmem>>, vector<1x32xf32>
      %cst_104 = arith.constant dense<0.000000e+00> : vector<8xf32>
      %200 = vector.multi_reduction <add>, %193, %cst_104 [1] : vector<8x32xf32> to vector<8xf32>
      %201 = vector.shape_cast %200 : vector<8xf32> to vector<8x1xf32>
      %cst_105 = arith.constant 3.200000e+01 : f32
      %202 = vector.broadcast %cst_105 : f32 to vector<8x1xf32>
      %203 = arith.divf %201, %202 : vector<8x1xf32>
      %204 = vector.broadcast %203 : vector<8x1xf32> to vector<8x32xf32>
      %205 = arith.subf %193, %204 : vector<8x32xf32>
      %206 = arith.mulf %205, %205 : vector<8x32xf32>
      %cst_106 = arith.constant dense<0.000000e+00> : vector<8xf32>
      %207 = vector.multi_reduction <add>, %206, %cst_106 [1] : vector<8x32xf32> to vector<8xf32>
      %208 = vector.shape_cast %207 : vector<8xf32> to vector<8x1xf32>
      %cst_107 = arith.constant 3.200000e+01 : f32
      %209 = vector.broadcast %cst_107 : f32 to vector<8x1xf32>
      %210 = arith.divf %208, %209 : vector<8x1xf32>
      %211 = vector.broadcast %203 : vector<8x1xf32> to vector<8x32xf32>
      %212 = arith.subf %193, %211 : vector<8x32xf32>
      %cst_108 = arith.constant 9.99999974E-6 : f32
      %213 = vector.broadcast %cst_108 : f32 to vector<8x1xf32>
      %214 = arith.addf %210, %213 : vector<8x1xf32>
      %215 = math.rsqrt %214 : vector<8x1xf32>
      %216 = vector.broadcast %215 : vector<8x1xf32> to vector<8x32xf32>
      %217 = arith.mulf %212, %216 : vector<8x32xf32>
      %218 = vector.broadcast %198 : vector<1x32xf32> to vector<8x32xf32>
      %219 = arith.mulf %217, %218 : vector<8x32xf32>
      %220 = vector.broadcast %199 : vector<1x32xf32> to vector<8x32xf32>
      %221 = arith.addf %219, %220 : vector<8x32xf32>
      %c0_109 = arith.constant 0 : index
      %c0_110 = arith.constant 0 : index
      %c0_111 = arith.constant 0 : index
      %222 = vector.load %arg23[%c0_109, %c0_110, %c0_111] : memref<1x8x32xf32, #tpu.memory_space<vmem>>, vector<1x8x32xf32>
      %223 = vector.shape_cast %222 : vector<1x8x32xf32> to vector<8x32xf32>
      %224 = vector.shape_cast %221 : vector<8x32xf32> to vector<1x8x32xf32>
      tpu.vector_store %arg23[%c0_109, %c0_110, %c0_111], %224 {strides = array<i32>} : memref<1x8x32xf32, #tpu.memory_space<vmem>>, vector<1x8x32xf32>,
    } else {
    }
    return
  }
  func.func @transform_0(%arg0: i32, %arg1: i32) -> (i32, i32, i32) {
    %c0_i32 = arith.constant 0 : i32
    %c0_i32_0 = arith.constant 0 : i32
    %c0_i32_1 = arith.constant 0 : i32
    return %arg0, %c0_i32, %c0_i32_0 : i32, i32, i32
  }
  func.func @transform_1(%arg0: i32, %arg1: i32) -> (i32, i32, i32) {
    %c0_i32 = arith.constant 0 : i32
    %c0_i32_0 = arith.constant 0 : i32
    %c0_i32_1 = arith.constant 0 : i32
    return %arg0, %c0_i32, %c0_i32_0 : i32, i32, i32
  }
  func.func @transform_2(%arg0: i32, %arg1: i32) -> (i32, i32, i32) {
    %c0_i32 = arith.constant 0 : i32
    %c0_i32_0 = arith.constant 0 : i32
    %c0_i32_1 = arith.constant 0 : i32
    return %arg0, %c0_i32, %c0_i32_0 : i32, i32, i32
  }
  func.func @transform_3(%arg0: i32, %arg1: i32) -> (i32, i32, i32) {
    %c0_i32 = arith.constant 0 : i32
    %c0_i32_0 = arith.constant 0 : i32
    %c0_i32_1 = arith.constant 0 : i32
    return %arg1, %c0_i32, %c0_i32_0 : i32, i32, i32
  }
  func.func @transform_4(%arg0: i32, %arg1: i32) -> (i32, i32, i32) {
    %c0_i32 = arith.constant 0 : i32
    %c0_i32_0 = arith.constant 0 : i32
    %c0_i32_1 = arith.constant 0 : i32
    return %arg1, %c0_i32, %c0_i32_0 : i32, i32, i32
  }
  func.func @transform_5(%arg0: i32, %arg1: i32) -> (i32, i32, i32) {
    %c0_i32 = arith.constant 0 : i32
    %c0_i32_0 = arith.constant 0 : i32
    %c0_i32_1 = arith.constant 0 : i32
    return %arg1, %c0_i32, %c0_i32_0 : i32, i32, i32
  }
  func.func @transform_6(%arg0: i32, %arg1: i32) -> (i32, i32, i32) {
    %c0_i32 = arith.constant 0 : i32
    %c0_i32_0 = arith.constant 0 : i32
    %c0_i32_1 = arith.constant 0 : i32
    return %arg1, %c0_i32, %c0_i32_0 : i32, i32, i32
  }
  func.func @transform_7(%arg0: i32, %arg1: i32) -> (i32, i32, i32) {
    %c0_i32 = arith.constant 0 : i32
    %c0_i32_0 = arith.constant 0 : i32
    %c0_i32_1 = arith.constant 0 : i32
    return %arg1, %c0_i32, %c0_i32_0 : i32, i32, i32
  }
  func.func @transform_8(%arg0: i32, %arg1: i32) -> (i32, i32, i32) {
    %c0_i32 = arith.constant 0 : i32
    %c0_i32_0 = arith.constant 0 : i32
    %c0_i32_1 = arith.constant 0 : i32
    return %arg1, %c0_i32, %c0_i32_0 : i32, i32, i32
  }
  func.func @transform_9(%arg0: i32, %arg1: i32) -> (i32, i32, i32) {
    %c0_i32 = arith.constant 0 : i32
    %c0_i32_0 = arith.constant 0 : i32
    %c0_i32_1 = arith.constant 0 : i32
    return %arg1, %c0_i32, %c0_i32_0 : i32, i32, i32
  }
  func.func @transform_10(%arg0: i32, %arg1: i32) -> (i32, i32, i32) {
    %c0_i32 = arith.constant 0 : i32
    %c0_i32_0 = arith.constant 0 : i32
    %c0_i32_1 = arith.constant 0 : i32
    return %arg1, %c0_i32, %c0_i32_0 : i32, i32, i32
  }
  func.func @transform_11(%arg0: i32, %arg1: i32) -> (i32, i32, i32) {
    %c0_i32 = arith.constant 0 : i32
    %c0_i32_0 = arith.constant 0 : i32
    %c0_i32_1 = arith.constant 0 : i32
    return %arg1, %c0_i32, %c0_i32_0 : i32, i32, i32
  }
  func.func @transform_12(%arg0: i32, %arg1: i32) -> (i32, i32, i32) {
    %c0_i32 = arith.constant 0 : i32
    %c0_i32_0 = arith.constant 0 : i32
    %c0_i32_1 = arith.constant 0 : i32
    return %arg1, %c0_i32, %c0_i32_0 : i32, i32, i32
  }
  func.func @transform_13(%arg0: i32, %arg1: i32) -> (i32, i32, i32) {
    %c0_i32 = arith.constant 0 : i32
    %c0_i32_0 = arith.constant 0 : i32
    %c0_i32_1 = arith.constant 0 : i32
    return %arg1, %c0_i32, %c0_i32_0 : i32, i32, i32
  }
  func.func @transform_14(%arg0: i32, %arg1: i32) -> (i32, i32, i32) {
    %c0_i32 = arith.constant 0 : i32
    %c0_i32_0 = arith.constant 0 : i32
    %c0_i32_1 = arith.constant 0 : i32
    return %arg1, %c0_i32, %c0_i32_0 : i32, i32, i32
  }
  func.func @transform_15(%arg0: i32, %arg1: i32) -> (i32, i32, i32) {
    %c0_i32 = arith.constant 0 : i32
    %c0_i32_0 = arith.constant 0 : i32
    %c0_i32_1 = arith.constant 0 : i32
    return %arg1, %c0_i32, %c0_i32_0 : i32, i32, i32
  }
  func.func @transform_16(%arg0: i32, %arg1: i32) -> (i32, i32, i32) {
    %c0_i32 = arith.constant 0 : i32
    %c0_i32_0 = arith.constant 0 : i32
    %c0_i32_1 = arith.constant 0 : i32
    return %arg1, %c0_i32, %c0_i32_0 : i32, i32, i32
  }
  func.func @transform_17(%arg0: i32, %arg1: i32) -> (i32, i32, i32) {
    %c0_i32 = arith.constant 0 : i32
    %c0_i32_0 = arith.constant 0 : i32
    %c0_i32_1 = arith.constant 0 : i32
    return %arg1, %c0_i32, %c0_i32_0 : i32, i32, i32
  }
  func.func @transform_18(%arg0: i32, %arg1: i32) -> (i32, i32, i32) {
    %c0_i32 = arith.constant 0 : i32
    %c0_i32_0 = arith.constant 0 : i32
    %c0_i32_1 = arith.constant 0 : i32
    return %arg1, %c0_i32, %c0_i32_0 : i32, i32, i32
  }
  func.func @transform_19(%arg0: i32, %arg1: i32) -> (i32, i32) {
    %c0_i32 = arith.constant 0 : i32
    %c0_i32_0 = arith.constant 0 : i32
    %c0_i32_1 = arith.constant 0 : i32
    return %c0_i32, %c0_i32_0 : i32, i32
  }
  func.func @transform_20(%arg0: i32, %arg1: i32) -> (i32, i32) {
    %c0_i32 = arith.constant 0 : i32
    %c0_i32_0 = arith.constant 0 : i32
    %c0_i32_1 = arith.constant 0 : i32
    return %c0_i32, %c0_i32_0 : i32, i32
  }
  func.func @transform_21(%arg0: i32, %arg1: i32) -> (i32, i32, i32) {
    %c0_i32 = arith.constant 0 : i32
    %c0_i32_0 = arith.constant 0 : i32
    %c0_i32_1 = arith.constant 0 : i32
    return %arg0, %c0_i32, %c0_i32_0 : i32, i32, i32
  }
}

</mosaic_0001>

<bundles_post_ra>
// kernel: image_captioning_forward.5
= control target key start
LH: loop header
LB: loop body
LE: loop exit
PB: predicated region body
PF: predicated region fallthrough
CT: control target
= control target key end

     0   :  { %vm71_vm0 = vcmask 261120   ;;  %v194_v0 = vmov 0.0   ;;  %vm195_vm1 = vmmov 0   ;;  %s256_s1 = inlined_call_operand.vmem [shape: bf16[128,32], index: 1, kind: input, shape index: {}]   ;;  %s257_s0 = inlined_call_operand.vmem [shape: f32[16,32], index: 0, kind: input, shape index: {}]   ;;  %s258_s2 = inlined_call_operand.vmem [shape: f32[16,128], index: 2, kind: output, shape index: {}]  }
   0x1   :  { %164 = vmatprep.subr.bf16.mxu0 %v194_v0  ;;  %v186_v1 = vld [vmem:[%s256_s1 + $0x38] sm:$0xff]   ;;  %180 = vmatprep.mubr.msk.bf16.mxu0 %vm195_vm1, %v194_v0  ;;  %v187_v3 = vld [vmem:[%s256_s1 + $0x30] sm:$0xff]   ;;  %v188_v5 = vld [vmem:[%s256_s1 + $0x28] sm:$0xff]  }
   0x2   :  { %v97_v2 = vsel %vm71_vm0, %v186_v1, 0  ;;  %v94_v4 = vsel %vm71_vm0, %v187_v3, 0  ;;  %v91_v6 = vsel %vm71_vm0, %v188_v5, 0  ;;  %v189_v7 = vld [vmem:[%s256_s1 + $0x20] sm:$0xff]   ;;  %v190_v9 = vld [vmem:[%s256_s1 + $0x18] sm:$0xff]   ;;  %v191_v11 = vld [vmem:[%s256_s1 + $0x10] sm:$0xff]  }
   0x3   :  { %165 = vmatpush3.bf16.xpose.msra.mxu0 %v97_v2  ;;  %v88_v8 = vsel %vm71_vm0, %v189_v7, 0  ;;  %v85_v10 = vsel %vm71_vm0, %v190_v9, 0  ;;  %v82_v12 = vsel %vm71_vm0, %v191_v11, 0  ;;  %v192_v13 = vld [vmem:[%s256_s1 + $0x8] sm:$0xff]   ;;  %v193_v15 = vld [vmem:[%s256_s1] sm:$0xff]  }
   0x4   :  { %166 = vmatprep.subr.bf16.mxu0 %v194_v0  ;;  %v79_v14 = vsel %vm71_vm0, %v192_v13, 0  ;;  %v76_v16 = vsel %vm71_vm0, %v193_v15, 0  ;;  %v12_v17 = vld [vmem:[%s257_s0] sm:$0xff]  ;;  %v13_v18 = vld [vmem:[%s257_s0 + $0x8] sm:$0xff] }
   0x5   :  { %v14_v19 = vpack.c.bf16 %v13_v18, %v12_v17 }
   0xb   :  { %167 = vmatpush3.bf16.xpose.msra.mxu0 %v94_v4 }
   0xc   :  { %168 = vmatprep.subr.bf16.mxu0 %v194_v0 }
  0x13   :  { %169 = vmatpush3.bf16.xpose.msra.mxu0 %v91_v6 }
  0x14   :  { %170 = vmatprep.subr.bf16.mxu0 %v194_v0 }
  0x1b   :  { %171 = vmatpush3.bf16.xpose.msra.mxu0 %v88_v8 }
  0x1c   :  { %172 = vmatprep.subr.bf16.mxu0 %v194_v0 }
  0x23   :  { %173 = vmatpush3.bf16.xpose.msra.mxu0 %v85_v10 }
  0x24   :  { %174 = vmatprep.subr.bf16.mxu0 %v194_v0 }
  0x2b   :  { %175 = vmatpush3.bf16.xpose.msra.mxu0 %v82_v12 }
  0x2c   :  { %176 = vmatprep.subr.bf16.mxu0 %v194_v0 }
  0x33   :  { %177 = vmatpush3.bf16.xpose.msra.mxu0 %v79_v14 }
  0x34   :  { %178 = vmatprep.subr.bf16.mxu0 %v194_v0 }
  0x3b   :  { %179 = vmatpush3.bf16.xpose.msra.mxu0 %v76_v16 }
  0x42   :  { %181 = vmatmul.mubr.msk.bf16.vlgmr.msra.gmra.mxu0 %vm71_vm0, %v14_v19 }
 0x102   :  { %v133_v20 = vpop.f32.mrf.mxu0 }
 0x103   :  { %140 = vst [vmem:[%s258_s2] sm:$0xff] %v133_v20 }
 0x104   :  { %v182_v21 = vpop.f32.mrf.mxu0 }
 0x106   :  { %v136_v22 = vpop.f32.mrf.mxu0 }
 0x107   :  { %141 = vst [vmem:[%s258_s2 + $0x8] sm:$0xff] %v136_v22 }
 0x108   :  { %v183_v23 = vpop.f32.mrf.mxu0 }

// kernel: image_captioning_forward.3
= control target key start
LH: loop header
LB: loop body
LE: loop exit
PB: predicated region body
PF: predicated region fallthrough
CT: control target
= control target key end

     0   :  { %vm43_vm0 = vcmask 130048   ;;  %v1261_v0 = vmov 0.0   ;;  %vm1262_vm1 = vmmov 0   ;;  %vm80_vm2 = vcmask 1041409   ;;  %s1263_s20 = smov 120   ;;  %s1266_s25 = smov 8   ;;  %s1477_s1 = inlined_call_operand.vmem [shape: bf16[16,32], index: 1, kind: input, shape index: {}]   ;;  %s1478_s0 = inlined_call_operand.vmem [shape: f32[2,16,16], index: 0, kind: input, shape index: {}]   ;;  %s1479_s3 = inlined_call_operand.vmem [shape: bf16[32,32], index: 3, kind: input, shape index: {}]   ;;  %s1480_s5 = inlined_call_operand.vmem [shape: bf16[32,32], index: 5, kind: input, shape index: {}]   ;;  %s1481_s7 = inlined_call_operand.vmem [shape: bf16[32,32], index: 7, kind: input, shape index: {}]   ;;  %s1482_s2 = inlined_call_operand.vmem [shape: f32[1,32], index: 2, kind: input, shape index: {}]   ;;  %s1483_s6 = inlined_call_operand.vmem [shape: f32[1,32], index: 6, kind: input, shape index: {}]   ;;  %s1484_s4 = inlined_call_operand.vmem [shape: f32[1,32], index: 4, kind: input, shape index: {}]   ;;  %s1485_s8 = inlined_call_operand.vmem [shape: f32[1,32], index: 8, kind: input, shape index: {}]   ;;  %s1486_s9 = inlined_call_operand.vmem [shape: bf16[32,32], index: 9, kind: input, shape index: {}]   ;;  %s1487_s10 = inlined_call_operand.vmem [shape: f32[1,32], index: 10, kind: input, shape index: {}]   ;;  %s1488_s11 = inlined_call_operand.vmem [shape: f32[2,32], index: 11, kind: output, shape index: {}]  }
   0x1   :  { %1150 = vmatprep.subr.bf16.mxu0 %v1261_v0  ;;  %v1236_v1 = vld [vmem:[%s1477_s1] sm:$0xff]   ;;  %1152 = vmatprep.mubr.msk.bf16.mxu0 %vm1262_vm1, %v1261_v0  ;;  %v40_v3 = vld [vmem:[%s1478_s0 + $0x8] sm:$0xff]  ;;  %v41_v4 = vld [vmem:[%s1478_s0 + $0x10] sm:$0xff]  ;;  %vm156_vm3 = vcmask 261120   ;;  %vm326_vm4 = vcmask 64512   ;;  %vm419_vm5 = vcmask 1041408  }
   0x2   :  { %v39_v2 = vld [vmem:[%s1478_s0] sm:$0xff]  ;;  %1156 = vmatprep.subr.bf16.mxu1 %v1261_v0  ;;  %1160 = vmatprep.mubr.msk.bf16.mxu1 %vm1262_vm1, %v1261_v0  ;;  %v42_v5 = vld [vmem:[%s1478_s0 + $0x18] sm:$0xff]  ;;  %v45_v7 = vsel %vm43_vm0, %v40_v3, 0.0  ;;  %v53_v8 = vsel %vm43_vm0, %v41_v4, 0.0  ;;  %v1237_v11 = vld [vmem:[%s1479_s3 + $0x8] sm:$0xff]   ;;  %vm403_vm6 = vcmask 9216  }
   0x3   :  { %1151 = vmatpush3.bf16.msra.mxu0 %v1236_v1  ;;  %v44_v6 = vsel %vm43_vm0, %v39_v2, 0.0  ;;  %v54_v10 = vsel %vm43_vm0, %v42_v5, 0.0  ;;  %1157 = vmatpush3.bf16.msra.mxu1 %v1237_v11  ;;  %v1238_v32 = vld [vmem:[%s1480_s5 + $0x8] sm:$0xff]   ;;  %v1239_v34 = vld [vmem:[%s1479_s3] sm:$0xff]   ;;  %vm415_vm7 = vcmask 15360   ;;  %vm493_vm8 = vcmask 58368  }
   0x4   :  { %v46_v9 = vadd.f32 %v45_v7, %v44_v6  ;;  %1164 = vmatprep.subr.bf16.mxu0 %v1261_v0  ;;  %v55_v12 = vadd.f32 %v54_v10, %v53_v8  ;;  %1158 = vmatprep.subr.bf16.mxu1 %v1261_v0  ;;  %v1240_v35 = vld [vmem:[%s1480_s5] sm:$0xff]   ;;  %v1241_v40 = vld [vmem:[%s1481_s7 + $0x8] sm:$0xff]   ;;  %s1267_s26 = smov 16   ;;  %s1268_s27 = smov 24   ;;  %vm665_vm9 = vcmask 123968   ;;  %vm837_vm10 = vcmask 189568  }
   0x5   :  { %v1085_v36 = vld [vmem:[%s1482_s2] ss:$0 sm:$0xff]  ;;  %vm1009_vm11 = vcmask 255168   ;;  %vm1079_vm12 = vcmask 254976  }
   0x6   :  { %v47_v13 = vrot.slane %v46_v9, 4  ;;  %v56_v14 = vrot.slane %v55_v12, 4  ;;  %v1242_v44 = vld [vmem:[%s1481_s7] sm:$0xff]  }
   0x7   :  { %1159 = vmatpush3.bf16.msra.mxu1 %v1239_v34  ;;  %v1092_v45 = vld [vmem:[%s1483_s6] ss:$0 sm:$0xff] }
   0x8   :  { %v48_v15 = vadd.f32 %v47_v13, %v46_v9  ;;  %v57_v16 = vadd.f32 %v56_v14, %v55_v12  ;;  %1172 = vmatprep.subr.bf16.mxu1 %v1261_v0  ;;  %v1088_v48 = vld [vmem:[%s1484_s4] ss:$0 sm:$0xff]  ;;  %s1264_s4 = smov 112  }
   0x9   :  { %v1096_v57 = vld [vmem:[%s1485_s8] ss:$0 sm:$0xff]  ;;  %s1265_s8 = smov 104  }
   0xa   :  { %v49_v17 = vrot.slane %v48_v15, 2  ;;  %v58_v18 = vrot.slane %v57_v16, 2 }
   0xc   :  { %v50_v19 = vadd.f32 %v49_v17, %v48_v15  ;;  %v59_v20 = vadd.f32 %v58_v18, %v57_v16 }
   0xe   :  { %v51_v21 = vrot.slane %v50_v19, 1  ;;  %v60_v22 = vrot.slane %v59_v20, 1 }
  0x10   :  { %v52_v23 = vadd.f32 %v51_v21, %v50_v19  ;;  %v61_v24 = vadd.f32 %v60_v22, %v59_v20 }
  0x12   :  { %v63_v25 = vmul.f32 0.0625, %v52_v23  ;;  %v64_v26 = vmul.f32 0.0625, %v61_v24 }
  0x14   :  { %v65_v27 = vpack.c.bf16 %v63_v25, %v63_v25  ;;  %v66_v28 = vpack.c.bf16 %v64_v26, %v64_v26 }
  0x16   :  { %v78_v29 = vunpack.c.l.b16 %v65_v27  ;;  %v79_v30 = vunpack.c.l.b16 %v66_v28 }
  0x18   :  { %v81_v31 = vsel %vm80_vm2, %v79_v30, %v78_v29 }
  0x19   :  { %v82_v33 = vpack.c.b16 %v81_v31, %v81_v31 }
  0x1b   :  { %1153 = vmatmul.mubr.msk.bf16.vlgmr.msra.gmra.mxu0 %vm43_vm0, %v82_v33 }
  0x1c   :  { %1165 = vmatpush3.bf16.msra.mxu0 %v1238_v32  ;;  %1168 = vmatprep.mubr.msk.bf16.mxu0 %vm1262_vm1, %v1261_v0 }
  0x1d   :  { %1166 = vmatprep.subr.bf16.mxu0 %v1261_v0 }
  0x20   :  { %1167 = vmatpush3.bf16.msra.mxu0 %v1240_v35 }
  0x21   :  { %1180 = vmatprep.subr.mxu0 %v1261_v0 }
  0xdb   :  { %v126_v37 = vpop.f32.mrf.mxu0 }
  0xdc   :  { %v127_v38 = vadd.f32 %v1085_v36, %v126_v37 }
  0xdd   :  { %v1154_v39 = vpop.f32.mrf.mxu0 }
  0xde   :  { %v132_v41 = vpack.c.bf16 %v127_v38, %v127_v38 }
  0xdf   :  { %v129_v42 = vpop.f32.mrf.mxu0 }
  0xe0   :  { %1161 = vmatmul.mubr.msk.bf16.vlgmr.msra.gmra.mxu1 %vm156_vm3, %v132_v41  ;;  %1169 = vmatmul.mubr.msk.bf16.vlgmr.msra.gmra.mxu0 %vm156_vm3, %v132_v41 }
  0xe1   :  { %v1155_v43 = vpop.f32.mrf.mxu0  ;;  %1173 = vmatpush3.bf16.msra.mxu1 %v1241_v40  ;;  %1176 = vmatprep.mubr.msk.bf16.mxu1 %vm1262_vm1, %v1261_v0 }
  0xe2   :  { %1174 = vmatprep.subr.bf16.mxu1 %v1261_v0  ;;  %1182 = vmatprep.mubr.msk.f32.mxu0 %vm1262_vm1, %v1261_v0 }
  0xe5   :  { %1175 = vmatpush3.bf16.msra.mxu1 %v1242_v44 }
  0xe6   :  { %1200 = vmatprep.subr.mxu1 %v1261_v0 }
  0xe8   :  { %1177 = vmatmul.mubr.msk.bf16.vlgmr.msra.gmra.mxu1 %vm156_vm3, %v132_v41 }
  0xe9   :  { %1202 = vmatprep.mubr.msk.f32.mxu1 %vm1262_vm1, %v1261_v0 }
 0x1a0   :  { %v194_v46 = vpop.f32.mrf.mxu1  ;;  %v257_v47 = vpop.f32.mrf.mxu0 }
 0x1a1   :  { %v258_v49 = vadd.f32 %v1092_v45, %v257_v47  ;;  %v195_v52 = vadd.f32 %v1088_v48, %v194_v46 }
 0x1a2   :  { %v1162_v50 = vpop.f32.mrf.mxu1  ;;  %v1170_v51 = vpop.f32.mrf.mxu0 }
 0x1a3   :  { %497 = vrot.lane.b32.xlu1 %v258_v49, %s1263_s20  ;;  %1181 = vmatpush3.xpose.msk.msra.mxu0 %vm326_vm4, %v258_v49 }
 0x1a4   :  { %v197_v53 = vpop.f32.mrf.mxu1  ;;  %v260_v54 = vpop.f32.mrf.mxu0  ;;  %1185 = vmatprep.subr.mxu0 %v1261_v0 }
 0x1a6   :  { %v1163_v55 = vpop.f32.mrf.mxu1  ;;  %v1171_v56 = vpop.f32.mrf.mxu0  ;;  %1183 = vmatmul.mubr.msk.f32.vlgmr.msra.gmra.mxu0 %vm326_vm4, %v195_v52 }
 0x1a7   :  { %495 = vrot.lane.b32.xlu1 %v195_v52, %s1263_s20  ;;  %1187 = vmatprep.mubr.msk.f32.mxu0 %vm1262_vm1, %v1261_v0  ;;  %v1243_v55 = vld [vmem:[%s1486_s9 + $0x8] sm:$0xff]   ;;  %v1244_v56 = vld [vmem:[%s1486_s9] sm:$0xff]  }
 0x1a8   :  { %v320_v58 = vpop.f32.mrf.mxu1 }
 0x1a9   :  { %v1410_v59 = vadd.f32 %v1096_v57, %v320_v58 }
 0x1aa   :  { %v1178_v60 = vpop.f32.mrf.mxu1 }
 0x1ab   :  { %667 = vrot.lane.b32.xlu1 %v195_v52, %s1264_s4  ;;  %1186 = vmatpush3.msk.msra.mxu0 %vm419_vm5, %v1410_v59 }
 0x1ac   :  { %v323_v61 = vpop.f32.mrf.mxu1  ;;  %1190 = vmatprep.subr.mxu0 %v1261_v0 }
 0x1ae   :  { %v1179_v62 = vpop.f32.mrf.mxu1 }
 0x1af   :  { %841 = vrot.lane.b32.xlu1 %v258_v49, %s1265_s8 }
 0x1b3   :  { %839 = vrot.lane.b32.xlu1 %v195_v52, %s1265_s8 }
 0x215   :  { %v498_v8 = vpop.permute.xlu1 %497 }
 0x219   :  { %v496_v9 = vpop.permute.xlu1 %495 }
 0x21d   :  { %v668_v10 = vpop.permute.xlu1 %667 }
 0x221   :  { %v842_v13 = vpop.permute.xlu1 %841 }
 0x225   :  { %v840_v14 = vpop.permute.xlu1 %839 }
 0x266   :  { %v399_v63 = vpop.f32.mrf.mxu0 }
 0x267   :  { %v404_v1 = vsel %vm403_vm6, %v399_v63, -inf }
 0x268   :  { %405 = vmax.xlane.f32.xlu0 %v404_v1  ;;  %v1184_v2 = vpop.f32.mrf.mxu0 }
 0x2f1   :  { %v406_v3 = vpop.xlane.xlu0 %405 }
 0x2f2   :  { %v407_v4 = vsub.f32 %v399_v63, %v406_v3 }
 0x2f4   :  { %v408_v5 = vmul.f32 1.442695, %v407_v4  ;;  %v1116_v4 = vld [vmem:[%s1487_s10] ss:$0 sm:$0xff] }
 0x2f6   :  { %1245 = vpow2.f32 %v408_v5 }
 0x303   :  { %v1246_v6 = vpop.eup %1245 }
 0x304   :  { %v410_v7 = vsel %vm403_vm6, %v1246_v6, 0.0 }
 0x305   :  { %411 = vadd.xlane.f32.xlu0 %v410_v7 }
 0x31b   :  { %669 = vrot.lane.b32.xlu0 %v258_v49, %s1264_s4 }
 0x38e   :  { %v412_v11 = vpop.xlane.xlu0 %411 }
 0x38f   :  { %1247 = vrcp.f32 %v412_v11 }
 0x392   :  { %v670_v12 = vpop.permute.xlu0 %669 }
 0x393   :  { %1201 = vmatpush3.xpose.msk.msra.mxu1 %vm326_vm4, %v670_v12 }
 0x394   :  { %1210 = vmatprep.subr.mxu1 %v1261_v0 }
 0x396   :  { %1203 = vmatmul.mubr.msk.f32.vlgmr.msra.gmra.mxu1 %vm326_vm4, %v668_v10 }
 0x397   :  { %1211 = vmatpush3.xpose.msk.msra.mxu1 %vm326_vm4, %v842_v13  ;;  %1212 = vmatprep.mubr.msk.f32.mxu1 %vm1262_vm1, %v1261_v0 }
 0x398   :  { %1220 = vmatprep.subr.bf16.mxu1 %v1261_v0 }
 0x39a   :  { %1213 = vmatmul.mubr.msk.f32.vlgmr.msra.gmra.mxu1 %vm326_vm4, %v840_v14 }
 0x39b   :  { %1224 = vmatprep.mubr.msk.bf16.mxu1 %vm1262_vm1, %v1261_v0  ;;  %1221 = vmatpush3.bf16.msra.mxu1 %v1243_v55 }
 0x39c   :  { %v1248_v15 = vpop.eup %1247  ;;  %1222 = vmatprep.subr.bf16.mxu1 %v1261_v0 }
 0x39d   :  { %v414_v16 = vmul.f32 %v1248_v15, %v1246_v6 }
 0x39f   :  { %1188 = vmatmul.mubr.msk.f32.vlgmr.msra.gmra.mxu0 %vm415_vm7, %v414_v16  ;;  %1223 = vmatpush3.bf16.msra.mxu1 %v1244_v56 }
 0x3a0   :  { %1191 = vmatpush3.xpose.msk.msra.mxu0 %vm326_vm4, %v498_v8  ;;  %1192 = vmatprep.mubr.msk.f32.mxu0 %vm1262_vm1, %v1261_v0 }
 0x3a1   :  { %1195 = vmatprep.subr.mxu0 %v1261_v0 }
 0x3a3   :  { %1193 = vmatmul.mubr.msk.f32.vlgmr.msra.gmra.mxu0 %vm326_vm4, %v496_v9 }
 0x3a4   :  { %1197 = vmatprep.mubr.msk.f32.mxu0 %vm1262_vm1, %v1261_v0 }
 0x456   :  { %v741_v17 = vpop.f32.mrf.mxu1 }
 0x457   :  { %v745_v18 = vsel %vm403_vm6, %v741_v17, -inf }
 0x458   :  { %746 = vmax.xlane.f32.xlu0 %v745_v18  ;;  %v1204_v19 = vpop.f32.mrf.mxu1 }
 0x45a   :  { %v913_v20 = vpop.f32.mrf.mxu1 }
 0x45b   :  { %v917_v27 = vsel %vm403_vm6, %v913_v20, -inf }
 0x45c   :  { %v1214_v21 = vpop.f32.mrf.mxu1 }
 0x45f   :  { %v489_v22 = vpop.f32.mrf.mxu0 }
 0x460   :  { %494 = vst.msk [vmem:[#allocation2] sm:$0x3] %vm493_vm8, %v489_v22 }
 0x461   :  { %v1189_v23 = vpop.f32.mrf.mxu0 }
 0x463   :  { %v569_v24 = vpop.f32.mrf.mxu0 }
 0x464   :  { %v573_v25 = vsel %vm403_vm6, %v569_v24, -inf }
 0x465   :  { %574 = vmax.xlane.f32.xlu1 %v573_v25  ;;  %v1194_v26 = vpop.f32.mrf.mxu0 }
 0x469   :  { %918 = vmax.xlane.f32.xlu1 %v917_v27 }
 0x4e1   :  { %v747_v28 = vpop.xlane.xlu0 %746 }
 0x4e2   :  { %v748_v29 = vsub.f32 %v741_v17, %v747_v28 }
 0x4e4   :  { %v749_v30 = vmul.f32 1.442695, %v748_v29 }
 0x4e6   :  { %1249 = vpow2.f32 %v749_v30 }
 0x4ee   :  { %v575_v31 = vpop.xlane.xlu1 %574 }
 0x4ef   :  { %v576_v39 = vsub.f32 %v569_v24, %v575_v31 }
 0x4f1   :  { %v577_v40 = vmul.f32 1.442695, %v576_v39 }
 0x4f2   :  { %v919_v32 = vpop.xlane.xlu1 %918 }
 0x4f3   :  { %v1250_v33 = vpop.eup %1249  ;;  %v920_v34 = vsub.f32 %v913_v20, %v919_v32 }
 0x4f4   :  { %v751_v35 = vsel %vm403_vm6, %v1250_v33, 0.0 }
 0x4f5   :  { %v921_v36 = vmul.f32 1.442695, %v920_v34  ;;  %752 = vadd.xlane.f32.xlu0 %v751_v35 }
 0x4f7   :  { %1251 = vpow2.f32 %v921_v36 }
 0x4f8   :  { %1253 = vpow2.f32 %v577_v40 }
 0x504   :  { %v1252_v37 = vpop.eup %1251 }
 0x505   :  { %v923_v38 = vsel %vm403_vm6, %v1252_v37, 0.0  ;;  %v1254_v41 = vpop.eup %1253 }
 0x506   :  { %924 = vadd.xlane.f32.xlu1 %v923_v38  ;;  %v579_v42 = vsel %vm403_vm6, %v1254_v41, 0.0 }
 0x50b   :  { %584 = vrot.lane.b32.xlu0 %v1410_v59, %s1263_s20 }
 0x517   :  { %756 = vrot.lane.b32.xlu1 %v1410_v59, %s1264_s4 }
 0x53b   :  { %580 = vadd.xlane.f32.xlu1 %v579_v42 }
 0x54c   :  { %928 = vrot.lane.b32.xlu1 %v1410_v59, %s1265_s8 }
 0x57e   :  { %v753_v43 = vpop.xlane.xlu0 %752 }
 0x582   :  { %v585_v44 = vpop.permute.xlu0 %584 }
 0x583   :  { %1196 = vmatpush3.msk.msra.mxu0 %vm419_vm5, %v585_v44 }
 0x584   :  { %1205 = vmatprep.subr.mxu0 %v1261_v0 }
 0x58f   :  { %v925_v45 = vpop.xlane.xlu1 %924 }
 0x593   :  { %v757_v46 = vpop.permute.xlu1 %756 }
 0x5c4   :  { %v581_v47 = vpop.xlane.xlu1 %580 }
 0x5c5   :  { %1255 = vrcp.f32 %v581_v47 }
 0x5c6   :  { %1257 = vrcp.f32 %v753_v43 }
 0x5c7   :  { %1259 = vrcp.f32 %v925_v45 }
 0x5c8   :  { %v929_v53 = vpop.permute.xlu1 %928 }
 0x5d2   :  { %v1256_v48 = vpop.eup %1255 }
 0x5d3   :  { %v583_v49 = vmul.f32 %v1256_v48, %v1254_v41  ;;  %v1258_v50 = vpop.eup %1257 }
 0x5d4   :  { %v755_v51 = vmul.f32 %v1258_v50, %v1250_v33  ;;  %v1260_v52 = vpop.eup %1259 }
 0x5d5   :  { %1198 = vmatmul.mubr.msk.f32.vlgmr.msra.gmra.mxu0 %vm415_vm7, %v583_v49  ;;  %v927_v54 = vmul.f32 %v1260_v52, %v1252_v37 }
 0x5d6   :  { %1206 = vmatpush3.msk.msra.mxu0 %vm419_vm5, %v757_v46  ;;  %1207 = vmatprep.mubr.msk.f32.mxu0 %vm1262_vm1, %v1261_v0 }
 0x5d7   :  { %1215 = vmatprep.subr.mxu0 %v1261_v0 }
 0x5d9   :  { %1208 = vmatmul.mubr.msk.f32.vlgmr.msra.gmra.mxu0 %vm415_vm7, %v755_v51 }
 0x5da   :  { %1216 = vmatpush3.msk.msra.mxu0 %vm419_vm5, %v929_v53  ;;  %1217 = vmatprep.mubr.msk.f32.mxu0 %vm1262_vm1, %v1261_v0 }
 0x5dd   :  { %1218 = vmatmul.mubr.msk.f32.vlgmr.msra.gmra.mxu0 %vm415_vm7, %v927_v54 }
 0x695   :  { %v657_v57 = vpop.f32.mrf.mxu0 }
 0x696   :  { %662 = vrot.lane.b32.xlu0 %v657_v57, %s1266_s25 }
 0x697   :  { %v1199_v58 = vpop.f32.mrf.mxu0 }
 0x699   :  { %v829_v59 = vpop.f32.mrf.mxu0 }
 0x69a   :  { %834 = vrot.lane.b32.xlu1 %v829_v59, %s1267_s26 }
 0x69b   :  { %v1209_v60 = vpop.f32.mrf.mxu0 }
 0x69d   :  { %v1001_v61 = vpop.f32.mrf.mxu0 }
 0x69e   :  { %1006 = vrot.lane.b32.xlu0 %v1001_v61, %s1268_s27 }
 0x69f   :  { %v1219_v62 = vpop.f32.mrf.mxu0 }
 0x708   :  { %v663_v63 = vpop.permute.xlu0 %662 }
 0x709   :  { %666 = vst.msk [vmem:[#allocation2] sm:$0x3] %vm665_vm9, %v663_v63 }
 0x70c   :  { %v835_v1 = vpop.permute.xlu1 %834 }
 0x70d   :  { %838 = vst.msk [vmem:[#allocation2] sm:$0x3] %vm837_vm10, %v835_v1 }
 0x710   :  { %v1007_v0 = vpop.permute.xlu0 %1006 }
 0x711   :  { %1010 = vst.msk [vmem:[#allocation2] sm:$0x3] %vm1009_vm11, %v1007_v0 }
 0x718   :  { %v1011_v2 = vld [vmem:[#allocation2] sm:$0x3] }
 0x719   :  { %v1012_v3 = vpack.c.bf16 %v1011_v2, %v1011_v2 }
 0x71b   :  { %1225 = vmatmul.mubr.msk.bf16.vlgmr.msra.gmra.mxu1 %vm156_vm3, %v1012_v3 }
 0x7db   :  { %v1073_v5 = vpop.f32.mrf.mxu1 }
 0x7dc   :  { %v1074_v6 = vadd.f32 %v1116_v4, %v1073_v5 }
 0x7dd   :  { %v1226_v7 = vpop.f32.mrf.mxu1 }
 0x7de   :  { %1080 = vst.msk [vmem:[%s1488_s11] sm:$0x3] %vm1079_vm12, %v1074_v6 }
 0x7df   :  { %v1076_v8 = vpop.f32.mrf.mxu1 }
 0x7e1   :  { %v1227_v9 = vpop.f32.mrf.mxu1 }

// kernel: image_captioning_forward.4
= control target key start
LH: loop header
LB: loop body
LE: loop exit
PB: predicated region body
PF: predicated region fallthrough
CT: control target
= control target key end

     0   :  { %s2888_s25 = smov 0   ;;  %s2890_s26 = smov 0   ;;  %s3209_s0 = inlined_call_operand.vmem [shape: f32[2,8,32], index: 0, kind: input, shape index: {}]   ;;  %s3210_s1 = inlined_call_operand.vmem [shape: f32[2,1,8], index: 1, kind: input, shape index: {}]   ;;  %s3211_s2 = inlined_call_operand.vmem [shape: f32[2,1,32], index: 2, kind: input, shape index: {}]   ;;  %s3212_s3 = inlined_call_operand.vmem [shape: f32[2,1,32], index: 3, kind: input, shape index: {}]   ;;  %s3213_s4 = inlined_call_operand.vmem [shape: f32[2,1,32], index: 4, kind: input, shape index: {}]   ;;  %s3214_s5 = inlined_call_operand.vmem [shape: bf16[2,32,96], index: 5, kind: input, shape index: {}]   ;;  %s3215_s6 = inlined_call_operand.vmem [shape: f32[2,1,96], index: 6, kind: input, shape index: {}]   ;;  %s3216_s7 = inlined_call_operand.vmem [shape: bf16[2,32,32], index: 7, kind: input, shape index: {}]   ;;  %s3217_s8 = inlined_call_operand.vmem [shape: f32[2,1,32], index: 8, kind: input, shape index: {}]   ;;  %s3218_s9 = inlined_call_operand.vmem [shape: bf16[2,32,32], index: 9, kind: input, shape index: {}]   ;;  %s3219_s10 = inlined_call_operand.vmem [shape: f32[2,1,32], index: 10, kind: input, shape index: {}]   ;;  %s3220_s11 = inlined_call_operand.vmem [shape: bf16[2,32,32], index: 11, kind: input, shape index: {}]   ;;  %s3221_s12 = inlined_call_operand.vmem [shape: f32[2,1,32], index: 12, kind: input, shape index: {}]   ;;  %s3222_s13 = inlined_call_operand.vmem [shape: f32[2,1,32], index: 13, kind: input, shape index: {}]   ;;  %s3223_s14 = inlined_call_operand.vmem [shape: f32[2,1,32], index: 14, kind: input, shape index: {}]   ;;  %s3224_s15 = inlined_call_operand.vmem [shape: bf16[2,32,64], index: 15, kind: input, shape index: {}]   ;;  %s3225_s16 = inlined_call_operand.vmem [shape: f32[2,1,64], index: 16, kind: input, shape index: {}]   ;;  %s3226_s17 = inlined_call_operand.vmem [shape: bf16[2,64,32], index: 17, kind: input, shape index: {}]   ;;  %s3227_s18 = inlined_call_operand.vmem [shape: f32[2,1,32], index: 18, kind: input, shape index: {}]   ;;  %s3228_s19 = inlined_call_operand.vmem [shape: f32[1,32], index: 19, kind: input, shape index: {}]   ;;  %s3229_s20 = inlined_call_operand.vmem [shape: f32[1,32], index: 20, kind: input, shape index: {}]   ;;  %s3230_s21 = inlined_call_operand.vmem [shape: f32[2,8,32], index: 21, kind: output, shape index: {}]  }
   0x1   :  { %3236 = sst [smem:[#allocation12_spill]] %s3209_s0  ;;  %s2892_s27 = smov 0  }
   0x2   :  { %3237 = sst [smem:[#allocation13_spill]] %s3210_s1 }
   0x3   :  { %3238 = sst [smem:[#allocation14_spill]] %s3211_s2  ;;  %s2886_s2 = smov 0  }
   0x4   :  { %3239 = sst [smem:[#allocation15_spill]] %s3212_s3  ;;  %s2894_s3 = smov 0  }
   0x5   :  { %3240 = sst [smem:[#allocation16_spill]] %s3213_s4 }
   0x6   :  { %3241 = sst [smem:[#allocation17_spill]] %s3214_s5 }
   0x7   :  { %3242 = sst [smem:[#allocation18_spill]] %s3216_s7 }
   0x8   :  { %3243 = sst [smem:[#allocation19_spill]] %s3217_s8 }
   0x9   :  { %3244 = sst [smem:[#allocation20_spill]] %s3218_s9 }
   0xa   :  { %3245 = sst [smem:[#allocation21_spill]] %s3219_s10 }
   0xb   :  { %3246 = sst [smem:[#allocation22_spill]] %s3220_s11 }
   0xc   :  { %3247 = sst [smem:[#allocation23_spill]] %s3221_s12 }
   0xd   :  { %3248 = sst [smem:[#allocation24_spill]] %s3223_s14 }
   0xe   :  { %3249 = sst [smem:[#allocation25_spill]] %s3224_s15 }
   0xf   :  { %3250 = sst [smem:[#allocation26_spill]] %s3225_s16 }
  0x10   :  { %3251 = sst [smem:[#allocation27_spill]] %s3226_s17 }
  0x11   :  { %3252 = sst [smem:[#allocation28_spill]] %s3227_s18 }
  0x12   :  { %3253 = sst [smem:[#allocation29_spill]] %s3228_s19 }
  0x13   :  { %3254 = sst [smem:[#allocation30_spill]] %s3229_s20 }
  0x14   :  { %3255 = sst [smem:[#allocation31_spill]] %s3230_s21 }
  0x15 LB: > { %3256 = sst [smem:[#allocation5_spill]] %s2741_s2  ;;  %s40_s28 = sadd.s32 1, %s2749_s26  ;;  %s2757_s3 = sphi %s2894_s3, %s31_s3   ;;  %s2753_s27 = sphi %s2892_s27, %s3308_s27   ;;  %s2749_s26 = sphi %s2890_s26, %s3307_s26   ;;  %s2745_s25 = sphi %s2888_s25, %s3306_s25   ;;  %s2741_s2 = sphi %s2886_s2, %s3305_s2  }
  0x16   : > { %3257 = sst [smem:[#allocation6_spill]] %s2749_s26  ;;  %s43_s29 = sadd.s32 1, %s2753_s27 }
  0x17   : > { %3258 = sst [smem:[#allocation7_spill]] %s2753_s27  ;;  %p41_p0 = scmp.ge.s32.totalorder %s40_s28, 2 }
  0x18   : > { %3259 = sst [smem:[#allocation8_spill]] %s2757_s3  ;;  %p2429_p1 = scmp.ge.s32.totalorder %s2757_s3, 1 }
  0x19   : > { %p754_p2 = scmp.lt.s32.totalorder %s2757_s3, 5  ;;  %s3310_s28 = smov (%p41_p0, %s40_s28), 0 }
  0x1a   : > { %3260 = sst [smem:[#allocation9_spill]] %s3310_s28  ;;  %s3312_s29 = smov (!%p41_p0, %s43_s29), %s2753_s27 }
  0x1b   : > { %p755_p3 = pnand %p2429_p1, %p754_p2  ;;  %p45_p4 = scmp.ge.s32.totalorder %s3312_s29, 2 }
  0x1d   : > { %s3314_s29 = smov (%p45_p4, %s3312_s29), 0  ;;  %758 = sbr.rel (%p755_p3) target bundleno = 3291 (0xcdb), region = 104 }
  0x1e   : > { %3261 = sst [smem:[#allocation10_spill]] %s3314_s29 }
  0x22   : > { %p878_p5 = scmp.lt.s32.totalorder %s2745_s25, 1  ;;  %p888_p6 = scmp.lt.s32.totalorder %s2741_s2, 1 }
  0x23   : > { %s3262_s22 = sld [smem:[#allocation13_spill]] }
  0x24   : > { %s3316_s25 = smov (!%p878_p5, %s2745_s25), 1  ;;  %s3263_s29 = sld [smem:[#allocation12_spill]] }
  0x25   : > { %s2922_s0 = scalar_select %p888_p6, %s2741_s2, 1 }
  0x26   : > { %s2430_s4 = sshll.u32 %s3316_s25, 3  ;;  %s3267_s26 = sld [smem:[#allocation17_spill]] }
  0x27   : > { %s2490_s5 = sshll.u32 %s2922_s0, 4  ;;  %s3268_s7 = sld [smem:[#allocation18_spill]] }
  0x28   : > { %s3270_s9 = sld [smem:[#allocation20_spill]] }
  0x29   : > { %s884_s23 = scalar_lea.vmem %s3262_s22, %s3316_s25  ;;  %s3272_s11 = sld [smem:[#allocation22_spill]] }
  0x2a   : > { %s881_s28 = scalar_lea.vmem %s3263_s29, %s2430_s4  ;;  %s3276_s22 = sld [smem:[#allocation25_spill]] }
  0x2b   : > { %s3278_s18 = sld [smem:[#allocation27_spill]] }
  0x2c   : > { %s2952_s27 = scalar_lea.vmem %s3267_s26, %s2490_s5  ;;  %s3279_s15 = sld [smem:[#allocation28_spill]] }
  0x2d   : > { %s2957_s19 = scalar_lea.vmem %s3268_s7, %s2490_s5 }
  0x2e   : > { %s2966_s30 = scalar_lea.vmem %s3270_s9, %s2490_s5  ;;  %s3280_s9 = sld [smem:[#allocation31_spill]] }
  0x2f   : > { %s2975_s29 = scalar_lea.vmem %s3272_s11, %s2490_s5  ;;  %s3277_s11 = sld [smem:[#allocation26_spill]] }
  0x30   : > { %3273 = sst [smem:[#allocation11_spill]] %s2975_s29  ;;  %s2992_s1 = scalar_lea.vmem %s3276_s22, %s2490_s5 }
  0x31   : > { %s2495_s29 = sshll.u32 %s2922_s0, 5  ;;  %s3281_s5 = sld [smem:[#allocation5_spill]] }
  0x32   : > { %s3002_s12 = scalar_lea.vmem %s3278_s18, %s2495_s29  ;;  %s947_s16 = scalar_lea.vmem %s3279_s15, %s2922_s0 }
  0x34   : > { %s3011_s8 = scalar_lea.vmem %s3280_s9, %s2430_s4 }
  0x35   : > { %s939_s10 = scalar_lea.vmem %s3277_s11, %s2922_s0 }
  0x37   : > { %p2444_p7 = scmp.ne.s32.totalorder %s3281_s5, 0 }
  0x39   : > { %956 = sbr.rel (%p2444_p7) target bundleno = 73 (0x49), region = 108 }
  0x3e   : > { %v957_v0 = vld [vmem:[%s881_s28] sm:$0xff]  ;;  %vm958_vm0 = vcmask 261120   ;;  %v960_v1 = vlaneseq  ;;  %v2759_v8 = vmov -1e+09   ;;  %vm976_vm2 = vcmask 64512  }
  0x3f   : > { %v966_v2 = vld [vmem:[%s884_s23] sm:$0x1]  ;;  %959 = vst.msk [vmem:[#allocation2] sm:$0xff] %vm958_vm0, %v957_v0 }
  0x40   : > { %v967_v3 = vsub.f32 1.0, %v966_v2  ;;  %v961_v4 = vshrl.u32 %v960_v1, 7  ;;  %v963_v5 = vand.u32 127, %v960_v1 }
  0x42   : > { %v968_v6 = vmul.f32 -1e+09, %v967_v3  ;;  %vm964_vm1 = vcmp.ge.s32.totalorder %v961_v4, %v963_v5  ;;  %v972_v7 = vsub.s32 0, %v961_v4 }
  0x43   : > { %v965_v9 = vsel %vm964_vm1, 0.0, %v2759_v8 }
  0x44   : > { %v973_v10 = vrot.slane %v968_v6, %v972_v7 }
  0x46   : > { %v975_v11 = vadd.f32 %v973_v10, %v965_v9 }
  0x48   : > { %977 = vst.msk [vmem:[#allocation3] sm:$0xff] %vm976_vm2, %v975_v11 }
  0x49 PF: > { %v3014_v12 = vld [vmem:[#allocation2] sm:$0xff]  ;;  %vm981_vm3 = vcmask 261120   ;;  %v2681_v19 = vld [vmem:[%s2952_s27 + $0x8] sm:$0xff]   ;;  %v2760_v20 = vmov 0.0   ;;  %vm2761_vm4 = vmmov 0   ;;  %s3282_s18 = sld [smem:[#allocation15_spill]]  ;;  %s3286_s22 = scalar_lea.vmem %s3215_s6, %s2922_s0 }
  0x4a   : > { %v982_v13 = vsel %vm981_vm3, %v3014_v12, 0.0  ;;  %2532 = vmatprep.subr.bf16.mxu0 %v2760_v20  ;;  %2536 = vmatprep.mubr.msk.bf16.mxu0 %vm2761_vm4, %v2760_v20  ;;  %v2682_v21 = vld [vmem:[%s2952_s27] sm:$0xff]   ;;  %s3284_s29 = sld [smem:[#allocation16_spill]]  ;;  %s2762_s24 = smov 64   ;;  %vm1081_vm5 = vcmask 64512   ;;  %vm1413_vm6 = vcmask 130112  }
  0x4b   : > { %983 = vadd.xlane.f32.xlu0 %v982_v13  ;;  %2533 = vmatpush3.bf16.msra.mxu0 %v2681_v19  ;;  %v2447_v32 = vld [vmem:[%s3286_s22] ss:$0 sm:$0xff]  ;;  %s2763_s26 = smov 96   ;;  %s2764_s20 = smov 88   ;;  %vm1584_vm7 = vcmask 195712   ;;  %vm1755_vm8 = vcmask 261312  }
  0x4c   : > { %2545 = vmatprep.subr.mxu1 %v2760_v20  ;;  %2534 = vmatprep.subr.bf16.mxu0 %v2760_v20  ;;  %s2765_s3 = smov 80   ;;  %s2766_s21 = smov 120   ;;  %vm2093_vm9 = vcmask 523264  }
  0x4d   : > { %2547 = vmatprep.mubr.msk.f32.mxu1 %vm2761_vm4, %v2760_v20  ;;  %s2767_s2 = smov 112   ;;  %s2768_s7 = smov 72  }
  0x4e   : > { %s2769_s17 = smov 104   ;;  %s2770_s5 = smov 48  }
  0x4f   : > { %2535 = vmatpush3.bf16.msra.mxu0 %v2682_v21  ;;  %s3283_s28 = scalar_lea.vmem %s3282_s18, %s2922_s0  ;;  %v1077_v40 = vld [vmem:[#allocation3] sm:$0xff]  ;;  %s2771_s9 = smov 40  }
  0x50   : > { %2540 = vmatprep.subr.mxu0 %v2760_v20  ;;  %v2445_v26 = vld [vmem:[%s3283_s28] ss:$0 sm:$0xff]  ;;  %s3285_s27 = scalar_lea.vmem %s3284_s29, %s2922_s0  ;;  %s2772_s11 = smov 56  }
  0x51   : > { %v2446_v28 = vld [vmem:[%s3285_s27] ss:$0 sm:$0xff]  ;;  %s3287_s4 = sld [smem:[#allocation14_spill]]  ;;  %s2775_s29 = smov 24  }
  0x52   : > { %s3289_s27 = sld [smem:[#allocation11_spill]] }
  0x53   : > { %s3290_s14 = sld [smem:[#allocation21_spill]] }
  0x57   : > { %s3288_s23 = scalar_lea.vmem %s3287_s4, %s3316_s25  ;;  %s2774_s25 = smov 16  }
  0x59   : > { %s3291_s22 = scalar_lea.vmem %s3290_s14, %s2922_s0 }
  0xd4   : > { %v984_v14 = vpop.xlane.xlu0 %983 }
  0xd5   : > { %v986_v15 = vmul.f32 0.03125, %v984_v14 }
  0xd7   : > { %v987_v16 = vsub.f32 %v3014_v12, %v986_v15 }
  0xd9   : > { %v988_v17 = vmul.f32 %v987_v16, %v987_v16 }
  0xdb   : > { %v989_v18 = vsel %vm981_vm3, %v988_v17, 0.0 }
  0xdc   : > { %990 = vadd.xlane.f32.xlu0 %v989_v18 }
 0x165   : > { %v991_v22 = vpop.xlane.xlu0 %990 }
 0x166   : > { %v992_v23 = vmul.f32 0.03125, %v991_v22 }
 0x168   : > { %v993_v24 = vadd.f32 1e-05, %v992_v23 }
 0x16a   : > { %2695 = vrsqrt.f32 %v993_v24 }
 0x177   : > { %v2696_v25 = vpop.eup %2695 }
 0x178   : > { %v995_v27 = vmul.f32 %v2696_v25, %v987_v16 }
 0x17a   : > { %v1002_v29 = vmul.f32 %v2445_v26, %v995_v27 }
 0x17c   : > { %v1009_v30 = vadd.f32 %v2446_v28, %v1002_v29 }
 0x17e   : > { %v1010_v31 = vpack.c.bf16 %v1009_v30, %v1009_v30 }
 0x180   : > { %2537 = vmatmul.mubr.msk.bf16.vlgmr.msra.gmra.mxu0 %vm981_vm3, %v1010_v31 }
 0x181   : > { %2542 = vmatprep.mubr.msk.f32.mxu0 %vm2761_vm4, %v2760_v20 }
 0x240   : > { %v1071_v33 = vpop.f32.mrf.mxu0 }
 0x241   : > { %v3048_v34 = vadd.f32 %v2447_v32, %v1071_v33 }
 0x242   : > { %v2538_v35 = vpop.f32.mrf.mxu0 }
 0x243   : > { %1167 = vrot.lane.b32.xlu0 %v3048_v34, %s2762_s24  ;;  %1079 = vrot.lane.b32.xlu1 %v3048_v34, %s2763_s26 }
 0x244   : > { %v1074_v36 = vpop.f32.mrf.mxu0 }
 0x246   : > { %v2539_v37 = vpop.f32.mrf.mxu0 }
 0x247   : > { %1246 = vrot.lane.b32.xlu0 %v3048_v34, %s2764_s20  ;;  %v2683_v37 = vld [vmem:[%s2966_s30 + $0x8] sm:$0xff]   ;;  %s3292_s20 = sld [smem:[#allocation23_spill]] }
 0x2b5   : > { %v1168_v38 = vpop.permute.xlu0 %1167  ;;  %v1080_v39 = vpop.permute.xlu1 %1079 }
 0x2b6   : > { %2541 = vmatpush3.xpose.msk.msra.mxu0 %vm1081_vm5, %v1080_v39  ;;  %2546 = vmatpush3.msra.mxu1 %v1168_v38  ;;  %v2684_v39 = vld [vmem:[%s2966_s30] sm:$0xff]   ;;  %s2773_s30 = smov 8  }
 0x2b7   : > { %2550 = vmatprep.subr.mxu1 %v2760_v20  ;;  %2555 = vmatprep.subr.mxu0 %v2760_v20 }
 0x2b9   : > { %2543 = vmatmul.mubr.msk.f32.vlgmr.msra.gmra.mxu0 %vm1081_vm5, %v3048_v34  ;;  %v1247_v50 = vpop.permute.xlu0 %1246 }
 0x2ba   : > { %2557 = vmatprep.mubr.msk.f32.mxu0 %vm2761_vm4, %v2760_v20 }
 0x379   : > { %v1152_v41 = vpop.f32.mrf.mxu0 }
 0x37a   : > { %v1153_v42 = vadd.f32 %v1152_v41, %v1077_v40 }
 0x37b   : > { %v2544_v43 = vpop.f32.mrf.mxu0 }
 0x37c   : > { %v1156_v44 = vsel %vm1081_vm5, %v1153_v42, -inf  ;;  %v2686_v43 = vld [vmem:[%s2957_s19] sm:$0xff]  }
 0x37d   : > { %1157 = vmax.xlane.f32.xlu1 %v1156_v44 }
 0x38e   : > { %1417 = vrot.lane.b32.xlu1 %v3048_v34, %s2765_s3  ;;  %s3293_s3 = scalar_lea.vmem %s3292_s20, %s2922_s0 }
 0x406   : > { %v1158_v45 = vpop.xlane.xlu1 %1157 }
 0x407   : > { %v1159_v46 = vsub.f32 %v1153_v42, %v1158_v45  ;;  %v2685_v42 = vld [vmem:[%s2957_s19 + $0x8] sm:$0xff]  }
 0x409   : > { %v1160_v47 = vmul.f32 1.442695, %v1159_v46 }
 0x40a   : > { %v1418_v56 = vpop.permute.xlu1 %1417 }
 0x40b   : > { %2697 = vpow2.f32 %v1160_v47 }
 0x418   : > { %v2698_v48 = vpop.eup %2697 }
 0x419   : > { %v1162_v49 = vsel %vm1081_vm5, %v2698_v48, 0.0 }
 0x41a   : > { %1163 = vadd.xlane.f32.xlu0 %v1162_v49 }
 0x430   : > { %1244 = vrot.lane.b32.xlu0 %v3048_v34, %s2766_s21 }
 0x434   : > { %1415 = vrot.lane.b32.xlu0 %v3048_v34, %s2767_s2 }
 0x438   : > { %1588 = vrot.lane.b32.xlu0 %v3048_v34, %s2768_s7  ;;  %s3294_s7 = sld [smem:[#allocation19_spill]] }
 0x43c   : > { %1586 = vrot.lane.b32.xlu0 %v3048_v34, %s2769_s17 }
 0x43e   : > { %s3295_s17 = scalar_lea.vmem %s3294_s7, %s2922_s0 }
 0x4a3   : > { %v1164_v51 = vpop.xlane.xlu0 %1163 }
 0x4a4   : > { %2699 = vrcp.f32 %v1164_v51 }
 0x4a7   : > { %v1245_v52 = vpop.permute.xlu0 %1244 }
 0x4ab   : > { %v1416_v55 = vpop.permute.xlu0 %1415 }
 0x4af   : > { %v1589_v57 = vpop.permute.xlu0 %1588 }
 0x4b1   : > { %v2700_v53 = vpop.eup %2699 }
 0x4b2   : > { %v1166_v54 = vmul.f32 %v2700_v53, %v2698_v48 }
 0x4b3   : > { %v1587_v58 = vpop.permute.xlu0 %1586 }
 0x4b4   : > { %2548 = vmatmul.mubr.msk.f32.vlgmr.msra.gmra.mxu1 %vm1081_vm5, %v1166_v54 }
 0x4b5   : > { %2551 = vmatpush3.xpose.msk.msra.mxu1 %vm1081_vm5, %v1247_v50  ;;  %2552 = vmatprep.mubr.msk.f32.mxu1 %vm2761_vm4, %v2760_v20 }
 0x4b6   : > { %2560 = vmatprep.subr.mxu1 %v2760_v20 }
 0x4b8   : > { %2553 = vmatmul.mubr.msk.f32.vlgmr.msra.gmra.mxu1 %vm1081_vm5, %v1245_v52 }
 0x4b9   : > { %2561 = vmatpush3.xpose.msk.msra.mxu1 %vm1081_vm5, %v1418_v56  ;;  %2562 = vmatprep.mubr.msk.f32.mxu1 %vm2761_vm4, %v2760_v20 }
 0x4ba   : > { %2570 = vmatprep.subr.mxu1 %v2760_v20 }
 0x4bc   : > { %2563 = vmatmul.mubr.msk.f32.vlgmr.msra.gmra.mxu1 %vm1081_vm5, %v1416_v55 }
 0x4bd   : > { %2571 = vmatpush3.xpose.msk.msra.mxu1 %vm1081_vm5, %v1589_v57  ;;  %2572 = vmatprep.mubr.msk.f32.mxu1 %vm2761_vm4, %v2760_v20 }
 0x4be   : > { %2580 = vmatprep.subr.bf16.mxu1 %v2760_v20 }
 0x4c0   : > { %2573 = vmatmul.mubr.msk.f32.vlgmr.msra.gmra.mxu1 %vm1081_vm5, %v1587_v58  ;;  %v2687_v58 = vld [vmem:[%s3289_s27 + $0x8] sm:$0xff]  }
 0x4c1   : > { %2584 = vmatprep.mubr.msk.bf16.mxu1 %vm2761_vm4, %v2760_v20  ;;  %2581 = vmatpush3.bf16.msra.mxu1 %v2685_v42 }
 0x4c2   : > { %2582 = vmatprep.subr.bf16.mxu1 %v2760_v20 }
 0x4c5   : > { %2583 = vmatpush3.bf16.msra.mxu1 %v2686_v43 }
 0x4c6   : > { %2596 = vmatprep.subr.bf16.mxu1 %v2760_v20 }
 0x574   : > { %v1239_v59 = vpop.f32.mrf.mxu1 }
 0x575   : > { %1243 = vst.msk [vmem:[#allocation4] sm:$0xff] %vm1081_vm5, %v1239_v59  ;;  %v1833_v59 = vld [vmem:[%s3291_s22] sm:$0x1] }
 0x576   : > { %v2549_v60 = vpop.f32.mrf.mxu1 }
 0x578   : > { %v1318_v61 = vpop.f32.mrf.mxu1 }
 0x579   : > { %v1319_v62 = vadd.f32 %v1318_v61, %v1077_v40 }
 0x57a   : > { %v2554_v63 = vpop.f32.mrf.mxu1 }
 0x57b   : > { %v1322_v0 = vsel %vm1081_vm5, %v1319_v62, -inf }
 0x57c   : > { %1323 = vmax.xlane.f32.xlu0 %v1322_v0  ;;  %v1489_v1 = vpop.f32.mrf.mxu1  ;;  %v1950_v0 = vlaneseq }
 0x57d   : > { %v1490_v2 = vadd.f32 %v1489_v1, %v1077_v40 }
 0x57e   : > { %v2564_v3 = vpop.f32.mrf.mxu1 }
 0x57f   : > { %v1493_v4 = vsel %vm1081_vm5, %v1490_v2, -inf  ;;  %v1951_v3 = vshrl.u32 %v1950_v0, 7 }
 0x580   : > { %1494 = vmax.xlane.f32.xlu1 %v1493_v4  ;;  %v1660_v5 = vpop.f32.mrf.mxu1 }
 0x581   : > { %v1661_v6 = vadd.f32 %v1660_v5, %v1077_v40  ;;  %v1827_v40 = vld [vmem:[%s3288_s23] sm:$0x1] }
 0x582   : > { %v2574_v7 = vpop.f32.mrf.mxu1  ;;  %v1828_v41 = vpack.c.bf16 %v1827_v40, %v1827_v40  ;;  %v2694_v40 = vld [vmem:[%s3002_s12] sm:$0xff]  }
 0x583   : > { %v1664_v8 = vsel %vm1081_vm5, %v1661_v6, -inf }
 0x584   : > { %1665 = vmax.xlane.f32.xlu0 %v1664_v8  ;;  %v1952_v8 = vsub.s32 0, %v1951_v3 }
 0x591   : > { %1504 = vrot.lane.b32.xlu1 %v3048_v34, %s2770_s5 }
 0x605   : > { %v1324_v9 = vpop.xlane.xlu0 %1323 }
 0x606   : > { %v1325_v10 = vsub.f32 %v1319_v62, %v1324_v9  ;;  %v2688_v62 = vld [vmem:[%s3289_s27] sm:$0xff]   ;;  %s3301_s27 = sld [smem:[#allocation5_spill]] }
 0x607   : > { %v2466_v9 = vld [vmem:[%s3295_s17] ss:$0 sm:$0xff] }
 0x608   : > { %v1326_v11 = vmul.f32 1.442695, %v1325_v10 }
 0x609   : > { %v1495_v13 = vpop.xlane.xlu1 %1494 }
 0x60a   : > { %2701 = vpow2.f32 %v1326_v11  ;;  %v1496_v14 = vsub.f32 %v1490_v2, %v1495_v13 }
 0x60c   : > { %v1497_v15 = vmul.f32 1.442695, %v1496_v14  ;;  %p2485_p8 = scmp.ne.s32.totalorder %s3301_s27, 1 }
 0x60d   : > { %v1666_v16 = vpop.xlane.xlu0 %1665  ;;  %v1505_v27 = vpop.permute.xlu1 %1504  ;;  %s3302_s19 = sld [smem:[#allocation29_spill]] (!%p2485_p8) }
 0x60e   : > { %2703 = vpow2.f32 %v1497_v15  ;;  %v1667_v17 = vsub.f32 %v1661_v6, %v1666_v16  ;;  %v1894_v6 = vld [vmem:[%s3293_s3] sm:$0x1]  ;;  %s3303_s22 = sld [smem:[#allocation30_spill]] (!%p2485_p8) }
 0x610   : > { %v1668_v18 = vmul.f32 1.442695, %v1667_v17 }
 0x612   : > { %2705 = vpow2.f32 %v1668_v18 }
 0x617   : > { %v2702_v19 = vpop.eup %2701 }
 0x618   : > { %v1328_v21 = vsel %vm1081_vm5, %v2702_v19, 0.0 }
 0x619   : > { %1329 = vadd.xlane.f32.xlu0 %v1328_v21 }
 0x61b   : > { %v2704_v22 = vpop.eup %2703 }
 0x61c   : > { %v1499_v23 = vsel %vm1081_vm5, %v2704_v22, 0.0 }
 0x61d   : > { %1500 = vadd.xlane.f32.xlu0 %v1499_v23 }
 0x61f   : > { %v2706_v24 = vpop.eup %2705 }
 0x620   : > { %v1670_v25 = vsel %vm1081_vm5, %v2706_v24, 0.0 }
 0x621   : > { %1671 = vadd.xlane.f32.xlu1 %v1670_v25  ;;  %v2689_v25 = vld [vmem:[%s2992_s1 + $0x8] sm:$0xff]  }
 0x632   : > { %1675 = vrot.lane.b32.xlu1 %v3048_v34, %s2771_s9 }
 0x633   : > { %1333 = vrot.lane.b32.xlu0 %v3048_v34, %s2772_s11  ;;  %s3296_s11 = scalar_lea.vmem %s3222_s13, %s2922_s0 }
 0x6a2   : > { %v1330_v26 = vpop.xlane.xlu0 %1329 }
 0x6a3   : > { %2707 = vrcp.f32 %v1330_v26  ;;  %v2690_v26 = vld [vmem:[%s2992_s1] sm:$0xff]   ;;  %s3297_s1 = sld [smem:[#allocation24_spill]] }
 0x6a6   : > { %v1501_v28 = vpop.xlane.xlu0 %1500 }
 0x6a7   : > { %2709 = vrcp.f32 %v1501_v28 }
 0x6a9   : > { %s3298_s4 = scalar_lea.vmem %s3297_s1, %s2922_s0 }
 0x6aa   : > { %v1672_v29 = vpop.xlane.xlu1 %1671  ;;  %v1334_v30 = vpop.permute.xlu0 %1333 }
 0x6ab   : > { %2711 = vrcp.f32 %v1672_v29  ;;  %2556 = vmatpush3.msra.mxu0 %v1334_v30 }
 0x6ac   : > { %2565 = vmatprep.subr.mxu0 %v2760_v20 }
 0x6ae   : > { %v1676_v35 = vpop.permute.xlu1 %1675 }
 0x6b0   : > { %v2708_v31 = vpop.eup %2707 }
 0x6b1   : > { %v1332_v32 = vmul.f32 %v2708_v31, %v2702_v19  ;;  %v2473_v31 = vld [vmem:[%s3296_s11] ss:$0 sm:$0xff] }
 0x6b3   : > { %2558 = vmatmul.mubr.msk.f32.vlgmr.msra.gmra.mxu0 %vm1081_vm5, %v1332_v32 }
 0x6b4   : > { %v2710_v33 = vpop.eup %2709  ;;  %2566 = vmatpush3.msra.mxu0 %v1505_v27  ;;  %2567 = vmatprep.mubr.msk.f32.mxu0 %vm2761_vm4, %v2760_v20 }
 0x6b5   : > { %2575 = vmatprep.subr.mxu0 %v2760_v20  ;;  %v1503_v34 = vmul.f32 %v2710_v33, %v2704_v22  ;;  %v2474_v33 = vld [vmem:[%s3298_s4] ss:$0 sm:$0xff] }
 0x6b7   : > { %2568 = vmatmul.mubr.msk.f32.vlgmr.msra.gmra.mxu0 %vm1081_vm5, %v1503_v34 }
 0x6b8   : > { %v2712_v36 = vpop.eup %2711  ;;  %2576 = vmatpush3.msra.mxu0 %v1676_v35  ;;  %2577 = vmatprep.mubr.msk.f32.mxu0 %vm2761_vm4, %v2760_v20 }
 0x6b9   : > { %v1674_v38 = vmul.f32 %v2712_v36, %v2706_v24  ;;  %2588 = vmatprep.subr.bf16.mxu0 %v2760_v20 }
 0x6bb   : > { %2578 = vmatmul.mubr.msk.f32.vlgmr.msra.gmra.mxu0 %vm1081_vm5, %v1674_v38  ;;  %v2692_v38 = vld [vmem:[%s3002_s12 + $0x10] sm:$0xff]  }
 0x6bc   : > { %2589 = vmatpush3.bf16.msra.mxu0 %v2683_v37  ;;  %2592 = vmatprep.mubr.msk.bf16.mxu0 %vm2761_vm4, %v2760_v20  ;;  %v2691_v37 = vld [vmem:[%s3002_s12 + $0x18] sm:$0xff]  }
 0x6bd   : > { %2590 = vmatprep.subr.bf16.mxu0 %v2760_v20 }
 0x6c0   : > { %2591 = vmatpush3.bf16.msra.mxu0 %v2684_v39  ;;  %v2693_v39 = vld [vmem:[%s3002_s12 + $0x8] sm:$0xff]  }
 0x6c1   : > { %2604 = vmatprep.subr.bf16.mxu0 %v2760_v20 }
 0x6c3   : > { %2593 = vmatmul.mubr.msk.bf16.vlgmr.msra.gmra.mxu0 %vm981_vm3, %v1828_v41  ;;  %v2475_v41 = vld [vmem:[%s939_s10] ss:$0 sm:$0xff] }
 0x6c4   : > { %2608 = vmatprep.mubr.msk.bf16.mxu0 %vm2761_vm4, %v2760_v20  ;;  %2605 = vmatpush3.bf16.msra.mxu0 %v2689_v25 }
 0x6c5   : > { %2606 = vmatprep.subr.bf16.mxu0 %v2760_v20 }
 0x6c8   : > { %2607 = vmatpush3.bf16.msra.mxu0 %v2690_v26 }
 0x773   : > { %v1405_v44 = vpop.f32.mrf.mxu0 }
 0x774   : > { %1410 = vrot.lane.b32.xlu1 %v1405_v44, %s2773_s30 }
 0x775   : > { %v2559_v45 = vpop.f32.mrf.mxu0 }
 0x777   : > { %v1576_v46 = vpop.f32.mrf.mxu0 }
 0x778   : > { %1581 = vrot.lane.b32.xlu0 %v1576_v46, %s2774_s25 }
 0x779   : > { %v2569_v47 = vpop.f32.mrf.mxu0 }
 0x77b   : > { %v1747_v48 = vpop.f32.mrf.mxu0 }
 0x77c   : > { %1752 = vrot.lane.b32.xlu1 %v1747_v48, %s2775_s29 }
 0x77d   : > { %v2579_v49 = vpop.f32.mrf.mxu0 }
 0x783   : > { %v1883_v50 = vpop.f32.mrf.mxu0 }
 0x784   : > { %v1884_v61 = vadd.f32 %v1883_v50, %v1833_v59 }
 0x785   : > { %v2594_v51 = vpop.f32.mrf.mxu0 }
 0x786   : > { %v1889_v63 = vpack.c.bf16 %v1884_v61, %v1884_v61 }
 0x787   : > { %v1886_v52 = vpop.f32.mrf.mxu0 }
 0x789   : > { %v2595_v53 = vpop.f32.mrf.mxu0 }
 0x7e6   : > { %v1411_v54 = vpop.permute.xlu1 %1410 }
 0x7e7   : > { %1414 = vst.msk [vmem:[#allocation4] sm:$0xff] %vm1413_vm6, %v1411_v54 }
 0x7ea   : > { %v1582_v55 = vpop.permute.xlu0 %1581 }
 0x7eb   : > { %1585 = vst.msk [vmem:[#allocation4] sm:$0xff] %vm1584_vm7, %v1582_v55 }
 0x7ee   : > { %v1753_v56 = vpop.permute.xlu1 %1752 }
 0x7ef   : > { %1756 = vst.msk [vmem:[#allocation4] sm:$0xff] %vm1755_vm8, %v1753_v56 }
 0x7f6   : > { %v1757_v57 = vld [vmem:[#allocation4] sm:$0xff] }
 0x7f7   : > { %v1758_v60 = vpack.c.bf16 %v1757_v57, %v1757_v57  ;;  %v2484_v57 = vld [vmem:[%s947_s16] ss:$0 sm:$0xff] }
 0x7f9   : > { %2585 = vmatmul.mubr.msk.bf16.vlgmr.msra.gmra.mxu1 %vm981_vm3, %v1758_v60 }
 0x7fa   : > { %2597 = vmatpush3.bf16.msra.mxu1 %v2687_v58  ;;  %2600 = vmatprep.mubr.msk.bf16.mxu1 %vm2761_vm4, %v2760_v20 }
 0x7fb   : > { %2598 = vmatprep.subr.bf16.mxu1 %v2760_v20 }
 0x7fe   : > { %2599 = vmatpush3.bf16.msra.mxu1 %v2688_v62 }
 0x7ff   : > { %2612 = vmatprep.subr.bf16.mxu1 %v2760_v20 }
 0x801   : > { %2601 = vmatmul.mubr.msk.bf16.vlgmr.msra.gmra.mxu1 %vm981_vm3, %v1889_v63 }
 0x802   : > { %2620 = vmatprep.mubr.msk.bf16.mxu1 %vm2761_vm4, %v2760_v20  ;;  %2613 = vmatpush3.bf16.msra.mxu1 %v2691_v37 }
 0x803   : > { %2614 = vmatprep.subr.bf16.mxu1 %v2760_v20 }
 0x806   : > { %2615 = vmatpush3.bf16.msra.mxu1 %v2692_v38 }
 0x807   : > { %2616 = vmatprep.subr.bf16.mxu1 %v2760_v20 }
 0x80a   : > { %2617 = vmatpush3.bf16.msra.mxu1 %v2693_v39 }
 0x80b   : > { %2618 = vmatprep.subr.bf16.mxu1 %v2760_v20 }
 0x80e   : > { %2619 = vmatpush3.bf16.msra.mxu1 %v2694_v40 }
 0x8b9   : > { %v1812_v1 = vpop.f32.mrf.mxu1 }
 0x8ba   : > { %v1818_v7 = vadd.f32 %v1812_v1, %v3014_v12 }
 0x8bb   : > { %v2586_v2 = vpop.f32.mrf.mxu1 }
 0x8bc   : > { %v1826_v14 = vadd.f32 %v2466_v9, %v1818_v7 }
 0x8bd   : > { %v1815_v4 = vpop.f32.mrf.mxu1 }
 0x8bf   : > { %v2587_v5 = vpop.f32.mrf.mxu1 }
 0x8c1   : > { %v1944_v10 = vpop.f32.mrf.mxu1 }
 0x8c2   : > { %v1945_v11 = vadd.f32 %v1944_v10, %v1894_v6 }
 0x8c3   : > { %v2602_v13 = vpop.f32.mrf.mxu1 }
 0x8c4   : > { %v1953_v15 = vrot.slane %v1945_v11, %v1952_v8 }
 0x8c5   : > { %v1947_v16 = vpop.f32.mrf.mxu1 }
 0x8c6   : > { %v1954_v17 = vadd.f32 %v1953_v15, %v1826_v14 }
 0x8c7   : > { %v2603_v18 = vpop.f32.mrf.mxu1 }
 0x8c8   : > { %v1957_v19 = vsel %vm981_vm3, %v1954_v17, 0.0 }
 0x8c9   : > { %1958 = vadd.xlane.f32.xlu0 %v1957_v19 }
 0x952   : > { %v1959_v12 = vpop.xlane.xlu0 %1958 }
 0x953   : > { %v1960_v21 = vmul.f32 0.03125, %v1959_v12 }
 0x955   : > { %v1961_v22 = vsub.f32 %v1954_v17, %v1960_v21 }
 0x957   : > { %v1962_v23 = vmul.f32 %v1961_v22, %v1961_v22 }
 0x959   : > { %v1963_v24 = vsel %vm981_vm3, %v1962_v23, 0.0 }
 0x95a   : > { %1964 = vadd.xlane.f32.xlu1 %v1963_v24 }
 0x9e3   : > { %v1965_v27 = vpop.xlane.xlu1 %1964 }
 0x9e4   : > { %v1966_v28 = vmul.f32 0.03125, %v1965_v27 }
 0x9e6   : > { %v1967_v29 = vadd.f32 1e-05, %v1966_v28 }
 0x9e8   : > { %2713 = vrsqrt.f32 %v1967_v29 }
 0x9f5   : > { %v2714_v30 = vpop.eup %2713 }
 0x9f6   : > { %v1969_v32 = vmul.f32 %v2714_v30, %v1961_v22 }
 0x9f8   : > { %v1976_v34 = vmul.f32 %v2473_v31, %v1969_v32 }
 0x9fa   : > { %v1983_v35 = vadd.f32 %v2474_v33, %v1976_v34 }
 0x9fc   : > { %v1984_v36 = vpack.c.bf16 %v1983_v35, %v1983_v35 }
 0x9fe   : > { %2609 = vmatmul.mubr.msk.bf16.vlgmr.msra.gmra.mxu0 %vm981_vm3, %v1984_v36 }
 0xabe   : > { %v2045_v42 = vpop.f32.mrf.mxu0 }
 0xabf   : > { %v2046_v43 = vadd.f32 %v2475_v41, %v2045_v42 }
 0xac0   : > { %v2610_v44 = vpop.f32.mrf.mxu0 }
 0xac1   : > { %v2052_v45 = vmul.f32 0.044715, %v2046_v43  ;;  %v2051_v20 = vmul.f32 0.5, %v2046_v43 }
 0xac2   : > { %v2048_v46 = vpop.f32.mrf.mxu0 }
 0xac3   : > { %v2053_v47 = vmul.f32 %v2052_v45, %v2046_v43 }
 0xac4   : > { %v2611_v48 = vpop.f32.mrf.mxu0 }
 0xac5   : > { %v2054_v49 = vmul.f32 %v2053_v47, %v2046_v43 }
 0xac7   : > { %v2055_v50 = vadd.f32 %v2054_v49, %v2046_v43 }
 0xac9   : > { %v2056_v51 = vmul.f32 0.7978846, %v2055_v50 }
 0xacb   : > { %2715 = vtanh.f32 %v2056_v51 }
 0xad8   : > { %v2716_v52 = vpop.eup %2715 }
 0xad9   : > { %v2058_v53 = vadd.f32 1.0, %v2716_v52 }
 0xadb   : > { %v2059_v54 = vmul.f32 %v2058_v53, %v2051_v20 }
 0xadd   : > { %v2060_v55 = vpack.c.bf16 %v2059_v54, %v2059_v54 }
 0xadf   : > { %2621 = vmatmul.mubr.msk.bf16.vlgmr.msra.gmra.mxu1 %vm2093_vm9, %v2060_v55 }
 0xb9f   : > { %v2131_v56 = vpop.f32.mrf.mxu1 }
 0xba0   : > { %v2137_v58 = vadd.f32 %v2131_v56, %v1954_v17 }
 0xba1   : > { %v2622_v59 = vpop.f32.mrf.mxu1  ;;  %2150 = sbr.rel (%p2485_p8) target bundleno = 3291 (0xcdb), region = 112 }
 0xba2   : > { %v2145_v60 = vadd.f32 %v2484_v57, %v2137_v58 }
 0xba3   : > { %v2134_v61 = vpop.f32.mrf.mxu1 }
 0xba4   : > { %2146 = vst.msk [vmem:[#allocation2] sm:$0xff] %vm981_vm3, %v2145_v60 }
 0xba5   : > { %v2623_v62 = vpop.f32.mrf.mxu1 }
 0xba6   : > { %v2153_v63 = vsel %vm981_vm3, %v2145_v60, 0.0  ;;  %v2486_v9 = vld [vmem:[%s3302_s19] ss:$0 sm:$0xff] }
 0xba7   : > { %2154 = vadd.xlane.f32.xlu0 %v2153_v63  ;;  %v2487_v11 = vld [vmem:[%s3303_s22] ss:$0 sm:$0xff] }
 0xc30   : > { %v2155_v0 = vpop.xlane.xlu0 %2154 }
 0xc31   : > { %v2156_v1 = vmul.f32 0.03125, %v2155_v0 }
 0xc33   : > { %v2157_v2 = vsub.f32 %v2145_v60, %v2156_v1 }
 0xc35   : > { %v2158_v3 = vmul.f32 %v2157_v2, %v2157_v2 }
 0xc37   : > { %v2159_v4 = vsel %vm981_vm3, %v2158_v3, 0.0 }
 0xc38   : > { %2160 = vadd.xlane.f32.xlu0 %v2159_v4 }
 0xcc1   : > { %v2161_v5 = vpop.xlane.xlu0 %2160 }
 0xcc2   : > { %v2162_v6 = vmul.f32 0.03125, %v2161_v5 }
 0xcc4   : > { %v2163_v7 = vadd.f32 1e-05, %v2162_v6 }
 0xcc6   : > { %2717 = vrsqrt.f32 %v2163_v7 }
 0xcd3   : > { %v2718_v8 = vpop.eup %2717 }
 0xcd4   : > { %v2165_v10 = vmul.f32 %v2718_v8, %v2157_v2 }
 0xcd6   : > { %v2172_v13 = vmul.f32 %v2486_v9, %v2165_v10 }
 0xcd8   : > { %v2179_v14 = vadd.f32 %v2487_v11, %v2172_v13 }
 0xcda   : > { %2180 = vst.msk [vmem:[%s3011_s8] sm:$0xff] %vm981_vm3, %v2179_v14 }
 0xcdb PF: > { %s3304_s24 = sld [smem:[#allocation8_spill]] }
 0xcdc   : > { %s3305_s2 = sld [smem:[#allocation6_spill]] }
 0xcdd   : > { %s3306_s25 = sld [smem:[#allocation7_spill]] }
 0xcde   : > { %s3307_s26 = sld [smem:[#allocation9_spill]] }
 0xcdf   : > { %s3308_s27 = sld [smem:[#allocation10_spill]] }
 0xce1   : > { %s31_s3 = sadd.s32 1, %s3304_s24  }
 0xce2   : > { %p28_p9 = scmp.ge.s32.totalorder %s31_s3, 6  }
 0xce4   :  { %30 = sbr.rel (!%p28_p9) target bundleno = 21 (0x15), region = 196 }

</bundles_post_ra>
